<compile_context>
chip_gen: v7x
topology: tpu7x:2x2x1
jax: 0.10.0
libtpu: 0.0.40
codegen_flags: <defaults>
</compile_context>

<pallas_src>
import jax
import jax.numpy as jnp
from jax.experimental import pallas as pl
from jax.experimental.pallas import tpu as pltpu


def _make_yolo_loss_kernel(S, B, C, rows_tile, n_valid_cells):
    """Kernel over a (Fdim, rows_tile, 128) cell-major block -> 5 partial sums."""
    inv_s = 1.0 / float(S)
    cells_per_block = rows_tile * 128
    slab = (rows_tile, 128)

    def kernel(pred_ref, tgt_ref, out_ref):
        f32 = jnp.float32

        def P(k):  # predicted feature k as a dense (rows_tile, 128) f32 slab
            return pred_ref[k].astype(f32)

        def T(k):  # target feature k
            return tgt_ref[k].astype(f32)

        # ---- validity mask for padded tail cells (global cell idx < n_valid) ----
        base = pl.program_id(0) * cells_per_block
        rid = jax.lax.broadcasted_iota(jnp.int32, slab, 0)
        lid = jax.lax.broadcasted_iota(jnp.int32, slab, 1)
        valid = (base + rid * 128 + lid) < n_valid_cells

        zero = jnp.zeros(slab, f32)

        conf0 = T(4)                                   # target conf of box slot 0
        obj = jnp.logical_and(conf0 > 0.0, valid)
        noobj = jnp.logical_and(conf0 == 0.0, valid)

        # ---- no-object confidence loss (all B conf features, noobj cells) ----
        acc_no = zero
        for b in range(B):
            d = P(4 + 5 * b) - T(4 + 5 * b)
            acc_no = acc_no + jnp.where(noobj, d * d, zero)

        # ---- class-probability loss (obj cells) ----
        acc_cl = zero
        for c in range(C):
            d = P(5 * B + c) - T(5 * B + c)
            acc_cl = acc_cl + jnp.where(obj, d * d, zero)

        # ---- target box (slot 0) in xyxy ----
        t_box = [tuple(T(5 * b + j) for j in range(4)) for b in range(B)]
        tx, ty, tw, th = t_box[0]
        t_ltx = tx * inv_s - 0.5 * tw
        t_lty = ty * inv_s - 0.5 * th
        t_rbx = tx * inv_s + 0.5 * tw
        t_rby = ty * inv_s + 0.5 * th
        t_area = (t_rbx - t_ltx) * (t_rby - t_lty)

        # ---- IoU of every predicted box with the target box ----
        p_box = []
        ious = []
        for b in range(B):
            px, py, pw, ph, pc = (P(5 * b + j) for j in range(5))
            p_box.append((px, py, pw, ph, pc))
            p_ltx = px * inv_s - 0.5 * pw
            p_lty = py * inv_s - 0.5 * ph
            p_rbx = px * inv_s + 0.5 * pw
            p_rby = py * inv_s + 0.5 * ph
            iw = jnp.maximum(jnp.minimum(t_rbx, p_rbx) - jnp.maximum(t_ltx, p_ltx), 0.0)
            ih = jnp.maximum(jnp.minimum(t_rby, p_rby) - jnp.maximum(t_lty, p_lty), 0.0)
            inter = iw * ih
            p_area = (p_rbx - p_ltx) * (p_rby - p_lty)
            union = jnp.maximum(t_area + p_area - inter, 1e-12)   # 0/0 guard
            ious.append(inter / union)

        # running argmax over the B boxes (first max wins, like torch .max(1))
        best_iou = ious[0]
        best_idx = jnp.zeros(slab, jnp.int32)
        for b in range(1, B):
            better = ious[b] > best_iou
            best_iou = jnp.where(better, ious[b], best_iou)
            best_idx = jnp.where(better, b, best_idx)

        # ---- responsible-box coord / wh / conf losses ----
        acc_xy = zero
        acc_wh = zero
        acc_cf = zero
        for b in range(B):
            sel = jnp.logical_and(obj, best_idx == b)
            px, py, pw, ph, pc = p_box[b]
            tbx, tby, tbw, tbh = t_box[b]
            dx = px - tbx
            dy = py - tby
            dw = pw - tbw
            dh = ph - tbh
            dc = pc - best_iou
            acc_xy = acc_xy + jnp.where(sel, dx * dx + dy * dy, zero)
            acc_wh = acc_wh + jnp.where(sel, dw * dw + dh * dh, zero)
            acc_cf = acc_cf + jnp.where(sel, dc * dc, zero)

        # ---- exactly five reductions per block ----
        loss_xy = jnp.sum(acc_xy)
        loss_wh = jnp.sum(acc_wh)
        loss_conf = jnp.sum(acc_cf)
        loss_noobj = jnp.sum(acc_no)
        loss_class = jnp.sum(acc_cl)

        # ---- emit partials into lanes 0..4 (one iota, five selects) ----
        lane = jax.lax.broadcasted_iota(jnp.int32, (8, 128), 1)
        out_ref[0] = jnp.where(lane == 0, loss_xy,
                     jnp.where(lane == 1, loss_wh,
                     jnp.where(lane == 2, loss_conf,
                     jnp.where(lane == 3, loss_noobj,
                     jnp.where(lane == 4, loss_class, 0.0)))))

    return kernel


def yolo_loss_pallas(pred, target, *, S, B, C, lambda_coord=5.0, lambda_noobj=0.5,
                     rows_tile=None, block_bytes=3 << 20,
                     vmem_limit_bytes=48 * 1024 * 1024):
    """Matches Loss.forward(pred, target) -> (loss, logger_dict)."""
    N, Fdim, S1, S2 = pred.shape
    assert Fdim == 5 * B + C and S1 == S and S2 == S
    assert target.shape == pred.shape

    n_cells = N * S * S
    total_rows = -(-n_cells // 128)                       # ceil(n_cells / 128)
    itemsize = jnp.dtype(pred.dtype).itemsize

    if rows_tile is None:
        # Size from the TRUE per-block VMEM footprint: Fdim x rows_tile x 128 x itemsize.
        rows_budget = max(8, ((block_bytes // (Fdim * 128 * itemsize)) // 8) * 8)
        rows_tile = rows_budget
        if total_rows >= 16:
            # keep grid_n >= 2 so the "parallel" axis can feed both v7x TensorCores
            half = (((-(-total_rows // 2)) + 7) // 8) * 8
            rows_tile = min(rows_tile, half)
        rows_tile = min(rows_tile, ((total_rows + 7) // 8) * 8)
    assert rows_tile % 8 == 0 and rows_tile > 0

    grid_n = -(-total_rows // rows_tile)
    rows_pad = grid_n * rows_tile
    n_cells_pad = rows_pad * 128

    def to_cell_major(x):
        # [N, F, S, S] -> [F, N*S*S] (cell-major) -> pad cells -> [F, rows_pad, 128]
        xt = jnp.transpose(x.reshape(N, Fdim, S * S), (1, 0, 2)).reshape(Fdim, n_cells)
        if n_cells_pad != n_cells:
            xt = jnp.pad(xt, ((0, 0), (0, n_cells_pad - n_cells)))
        return xt.reshape(Fdim, rows_pad, 128)

    p_cm = to_cell_major(pred)      # keep native dtype; cast after the DMA in-kernel
    t_cm = to_cell_major(target)

    partials = pl.pallas_call(
        _make_yolo_loss_kernel(S, B, C, rows_tile, n_cells),
        out_shape=jax.ShapeDtypeStruct((grid_n, 8, 128), jnp.float32),
        grid=(grid_n,),
        in_specs=[
            pl.BlockSpec((Fdim, rows_tile, 128), lambda i: (0, i, 0)),
            pl.BlockSpec((Fdim, rows_tile, 128), lambda i: (0, i, 0)),
        ],
        out_specs=pl.BlockSpec((1, 8, 128), lambda i: (i, 0, 0)),
        compiler_params=pltpu.CompilerParams(
            dimension_semantics=("parallel",),     # independent per-block partials
            vmem_limit_bytes=vmem_limit_bytes,
        ),
    )(p_cm, t_cm)

    comps = jnp.sum(partials[:, 0, :5], axis=0)            # (5,) raw loss sums
    loss_xy, loss_wh, loss_conf, loss_noobj, loss_class = (comps[i] for i in range(5))
    loss = (lambda_coord * (loss_xy + loss_wh) + loss_conf
            + lambda_noobj * loss_noobj + loss_class) / N

    # jit/trace-friendly logger (device scalars; format on host outside the hot path).
    # TODO(synk): LossCounter is host-side string formatting only; values match it.
    logger_loss = {
        'Coordinates loss': loss_xy / N,
        'Width/Height loss': loss_wh / N,
        'Confidence loss': loss_conf / N,
        'No object loss': loss_noobj / N,
        'Class probabilities loss': loss_class / N,
        'Total loss': loss,
    }
    return loss, logger_loss


def yolo_loss_ref(pred, target, *, S, B, C, lambda_coord=5.0, lambda_noobj=0.5):
    """Pure-JAX reference (same masked-sum semantics as the PyTorch module)."""
    N = pred.shape[0]
    Fdim = 5 * B + C
    p = jnp.swapaxes(pred.reshape(N, Fdim, S * S), 1, 2).reshape(-1, Fdim).astype(jnp.float32)
    t = jnp.swapaxes(target.reshape(N, Fdim, S * S), 1, 2).reshape(-1, Fdim).astype(jnp.float32)
    obj = t[:, 4] > 0
    noobj = t[:, 4] == 0
    inv_s = 1.0 / float(S)

    loss_noobj = 0.0
    for b in range(B):
        d = p[:, 4 + 5 * b] - t[:, 4 + 5 * b]
        loss_noobj = loss_noobj + jnp.sum(jnp.where(noobj, d * d, 0.0))

    t_ltx = t[:, 0] * inv_s - 0.5 * t[:, 2]
    t_lty = t[:, 1] * inv_s - 0.5 * t[:, 3]
    t_rbx = t[:, 0] * inv_s + 0.5 * t[:, 2]
    t_rby = t[:, 1] * inv_s + 0.5 * t[:, 3]
    t_area = (t_rbx - t_ltx) * (t_rby - t_lty)

    ious = []
    for b in range(B):
        p_ltx = p[:, 5 * b] * inv_s - 0.5 * p[:, 5 * b + 2]
        p_lty = p[:, 5 * b + 1] * inv_s - 0.5 * p[:, 5 * b + 3]
        p_rbx = p[:, 5 * b] * inv_s + 0.5 * p[:, 5 * b + 2]
        p_rby = p[:, 5 * b + 1] * inv_s + 0.5 * p[:, 5 * b + 3]
        iw = jnp.maximum(jnp.minimum(t_rbx, p_rbx) - jnp.maximum(t_ltx, p_ltx), 0.0)
        ih = jnp.maximum(jnp.minimum(t_rby, p_rby) - jnp.maximum(t_lty, p_lty), 0.0)
        inter = iw * ih
        p_area = (p_rbx - p_ltx) * (p_rby - p_lty)
        ious.append(inter / (t_area + p_area - inter))

    best_iou = ious[0]
    best_idx = jnp.zeros(best_iou.shape, dtype=jnp.int32)
    for b in range(1, B):
        better = ious[b] > best_iou
        best_iou = jnp.where(better, ious[b], best_iou)
        best_idx = jnp.where(better, b, best_idx)

    loss_xy = loss_wh = loss_conf = 0.0
    for b in range(B):
        sel = jnp.logical_and(obj, best_idx == b)
        dx = p[:, 5 * b] - t[:, 5 * b]
        dy = p[:, 5 * b + 1] - t[:, 5 * b + 1]
        dw = p[:, 5 * b + 2] - t[:, 5 * b + 2]
        dh = p[:, 5 * b + 3] - t[:, 5 * b + 3]
        dc = p[:, 5 * b + 4] - best_iou
        loss_xy = loss_xy + jnp.sum(jnp.where(sel, dx * dx + dy * dy, 0.0))
        loss_wh = loss_wh + jnp.sum(jnp.where(sel, dw * dw + dh * dh, 0.0))
        loss_conf = loss_conf + jnp.sum(jnp.where(sel, dc * dc, 0.0))

    loss_class = 0.0
    for c in range(C):
        d = p[:, 5 * B + c] - t[:, 5 * B + c]
        loss_class = loss_class + jnp.sum(jnp.where(obj, d * d, 0.0))

    return (lambda_coord * (loss_xy + loss_wh) + loss_conf
            + lambda_noobj * loss_noobj + loss_class) / N


if __name__ == "__main__":
    # Classic YOLO-v1 head dims at a small batch: S=7 grid, B=2 boxes, C=20 classes.
    S, B, C = 7, 2, 20
    N = 16
    Fdim = 5 * B + C  # 30

    key = jax.random.PRNGKey(0)
    k_box, k_conf, k_pred = jax.random.split(key, 3)

    # YOLO-style target: same box replicated across the B slots, conf in {0,1},
    # class probabilities equal to conf.
    box = jax.random.uniform(k_box, (N, 4, S, S), minval=0.1, maxval=0.9, dtype=jnp.float32)
    conf = (jax.random.uniform(k_conf, (N, 1, S, S)) > 0.5).astype(jnp.float32)
    cls = jnp.broadcast_to(conf, (N, C, S, S))
    cell = jnp.concatenate([box, conf], axis=1)                    # (N, 5, S, S)
    target = jnp.concatenate([cell] * B + [cls], axis=1)           # (N, 30, S, S)

    pred = jax.random.uniform(k_pred, (N, Fdim, S, S), minval=0.05, maxval=0.95,
                              dtype=jnp.float32)                   # (N, 30, S, S)

    loss, logger = yolo_loss_pallas(pred, target, S=S, B=B, C=C)
    loss = jax.block_until_ready(loss)

    # Sanity-check against the pure-JAX reference.
    ref = jax.block_until_ready(yolo_loss_ref(pred, target, S=S, B=B, C=C))
    assert jnp.isfinite(loss)
    assert jnp.allclose(loss, ref, rtol=1e-4, atol=1e-4), (loss, ref)
    assert jnp.allclose(logger['Total loss'], ref, rtol=1e-4, atol=1e-4)

    print("KERNEL_OK")
</pallas_src>

<mosaic_0001>
module attributes {stable_mosaic.version = 11 : i64} {
  func.func @kernel(%arg0: i32, %arg1: memref<30x8x128xf32, #tpu.memory_space<vmem>>, %arg2: memref<30x8x128xf32, #tpu.memory_space<vmem>>, %arg3: memref<1x8x128xf32, #tpu.memory_space<vmem>>) attributes {dimension_semantics = [#tpu.dimension_semantics<parallel>], iteration_bounds = array<i64: 1>, scalar_prefetch = 0 : i64, scratch_operands = 0 : i64, tpu.core_type = #tpu.core_type<tc>, window_params = [{transform_indices = @transform_0, window_bounds = array<i64: 30, 8, 128>}, {transform_indices = @transform_1, window_bounds = array<i64: 30, 8, 128>}, {transform_indices = @transform_2, window_bounds = array<i64: 1, 8, 128>}]} {
    %c1024_i32 = arith.constant 1024 : i32
    %0 = arith.muli %arg0, %c1024_i32 : i32
    %1 = tpu.iota {dimensions = array<i32: 0>} : vector<8x128xi32>
    %2 = tpu.iota {dimensions = array<i32: 1>} : vector<8x128xi32>
    %c128_i32 = arith.constant 128 : i32
    %3 = vector.broadcast %c128_i32 : i32 to vector<8x128xi32>
    %4 = arith.muli %1, %3 : vector<8x128xi32>
    %5 = vector.broadcast %0 : i32 to vector<8x128xi32>
    %6 = arith.addi %5, %4 : vector<8x128xi32>
    %7 = arith.addi %6, %2 : vector<8x128xi32>
    %c784_i32 = arith.constant 784 : i32
    %8 = vector.broadcast %c784_i32 : i32 to vector<8x128xi32>
    %9 = arith.cmpi slt, %7, %8 : vector<8x128xi32>
    %cst = arith.constant 0.000000e+00 : f32
    %10 = vector.broadcast %cst : f32 to vector<8x128xf32>
    %c4 = arith.constant 4 : index
    %c0 = arith.constant 0 : index
    %c0_0 = arith.constant 0 : index
    %11 = vector.load %arg2[%c4, %c0, %c0_0] : memref<30x8x128xf32, #tpu.memory_space<vmem>>, vector<1x8x128xf32>
    %12 = vector.shape_cast %11 : vector<1x8x128xf32> to vector<8x128xf32>
    %cst_1 = arith.constant 0.000000e+00 : f32
    %13 = vector.broadcast %cst_1 : f32 to vector<8x128xf32>
    %14 = arith.cmpf ogt, %12, %13 : vector<8x128xf32>
    %15 = arith.andi %14, %9 : vector<8x128xi1>
    %cst_2 = arith.constant 0.000000e+00 : f32
    %16 = vector.broadcast %cst_2 : f32 to vector<8x128xf32>
    %17 = arith.cmpf oeq, %12, %16 : vector<8x128xf32>
    %18 = arith.andi %17, %9 : vector<8x128xi1>
    %c4_3 = arith.constant 4 : index
    %c0_4 = arith.constant 0 : index
    %c0_5 = arith.constant 0 : index
    %19 = vector.load %arg1[%c4_3, %c0_4, %c0_5] : memref<30x8x128xf32, #tpu.memory_space<vmem>>, vector<1x8x128xf32>
    %20 = vector.shape_cast %19 : vector<1x8x128xf32> to vector<8x128xf32>
    %c4_6 = arith.constant 4 : index
    %c0_7 = arith.constant 0 : index
    %c0_8 = arith.constant 0 : index
    %21 = vector.load %arg2[%c4_6, %c0_7, %c0_8] : memref<30x8x128xf32, #tpu.memory_space<vmem>>, vector<1x8x128xf32>
    %22 = vector.shape_cast %21 : vector<1x8x128xf32> to vector<8x128xf32>
    %23 = arith.subf %20, %22 : vector<8x128xf32>
    %24 = arith.mulf %23, %23 : vector<8x128xf32>
    %25 = arith.select %18, %24, %10 : vector<8x128xi1>, vector<8x128xf32>
    %26 = arith.addf %10, %25 : vector<8x128xf32>
    %c9 = arith.constant 9 : index
    %c0_9 = arith.constant 0 : index
    %c0_10 = arith.constant 0 : index
    %27 = vector.load %arg1[%c9, %c0_9, %c0_10] : memref<30x8x128xf32, #tpu.memory_space<vmem>>, vector<1x8x128xf32>
    %28 = vector.shape_cast %27 : vector<1x8x128xf32> to vector<8x128xf32>
    %c9_11 = arith.constant 9 : index
    %c0_12 = arith.constant 0 : index
    %c0_13 = arith.constant 0 : index
    %29 = vector.load %arg2[%c9_11, %c0_12, %c0_13] : memref<30x8x128xf32, #tpu.memory_space<vmem>>, vector<1x8x128xf32>
    %30 = vector.shape_cast %29 : vector<1x8x128xf32> to vector<8x128xf32>
    %31 = arith.subf %28, %30 : vector<8x128xf32>
    %32 = arith.mulf %31, %31 : vector<8x128xf32>
    %33 = arith.select %18, %32, %10 : vector<8x128xi1>, vector<8x128xf32>
    %34 = arith.addf %26, %33 : vector<8x128xf32>
    %c10 = arith.constant 10 : index
    %c0_14 = arith.constant 0 : index
    %c0_15 = arith.constant 0 : index
    %35 = vector.load %arg1[%c10, %c0_14, %c0_15] : memref<30x8x128xf32, #tpu.memory_space<vmem>>, vector<1x8x128xf32>
    %36 = vector.shape_cast %35 : vector<1x8x128xf32> to vector<8x128xf32>
    %c10_16 = arith.constant 10 : index
    %c0_17 = arith.constant 0 : index
    %c0_18 = arith.constant 0 : index
    %37 = vector.load %arg2[%c10_16, %c0_17, %c0_18] : memref<30x8x128xf32, #tpu.memory_space<vmem>>, vector<1x8x128xf32>
    %38 = vector.shape_cast %37 : vector<1x8x128xf32> to vector<8x128xf32>
    %39 = arith.subf %36, %38 : vector<8x128xf32>
    %40 = arith.mulf %39, %39 : vector<8x128xf32>
    %41 = arith.select %15, %40, %10 : vector<8x128xi1>, vector<8x128xf32>
    %42 = arith.addf %10, %41 : vector<8x128xf32>
    %c11 = arith.constant 11 : index
    %c0_19 = arith.constant 0 : index
    %c0_20 = arith.constant 0 : index
    %43 = vector.load %arg1[%c11, %c0_19, %c0_20] : memref<30x8x128xf32, #tpu.memory_space<vmem>>, vector<1x8x128xf32>
    %44 = vector.shape_cast %43 : vector<1x8x128xf32> to vector<8x128xf32>
    %c11_21 = arith.constant 11 : index
    %c0_22 = arith.constant 0 : index
    %c0_23 = arith.constant 0 : index
    %45 = vector.load %arg2[%c11_21, %c0_22, %c0_23] : memref<30x8x128xf32, #tpu.memory_space<vmem>>, vector<1x8x128xf32>
    %46 = vector.shape_cast %45 : vector<1x8x128xf32> to vector<8x128xf32>
    %47 = arith.subf %44, %46 : vector<8x128xf32>
    %48 = arith.mulf %47, %47 : vector<8x128xf32>
    %49 = arith.select %15, %48, %10 : vector<8x128xi1>, vector<8x128xf32>
    %50 = arith.addf %42, %49 : vector<8x128xf32>
    %c12 = arith.constant 12 : index
    %c0_24 = arith.constant 0 : index
    %c0_25 = arith.constant 0 : index
    %51 = vector.load %arg1[%c12, %c0_24, %c0_25] : memref<30x8x128xf32, #tpu.memory_space<vmem>>, vector<1x8x128xf32>
    %52 = vector.shape_cast %51 : vector<1x8x128xf32> to vector<8x128xf32>
    %c12_26 = arith.constant 12 : index
    %c0_27 = arith.constant 0 : index
    %c0_28 = arith.constant 0 : index
    %53 = vector.load %arg2[%c12_26, %c0_27, %c0_28] : memref<30x8x128xf32, #tpu.memory_space<vmem>>, vector<1x8x128xf32>
    %54 = vector.shape_cast %53 : vector<1x8x128xf32> to vector<8x128xf32>
    %55 = arith.subf %52, %54 : vector<8x128xf32>
    %56 = arith.mulf %55, %55 : vector<8x128xf32>
    %57 = arith.select %15, %56, %10 : vector<8x128xi1>, vector<8x128xf32>
    %58 = arith.addf %50, %57 : vector<8x128xf32>
    %c13 = arith.constant 13 : index
    %c0_29 = arith.constant 0 : index
    %c0_30 = arith.constant 0 : index
    %59 = vector.load %arg1[%c13, %c0_29, %c0_30] : memref<30x8x128xf32, #tpu.memory_space<vmem>>, vector<1x8x128xf32>
    %60 = vector.shape_cast %59 : vector<1x8x128xf32> to vector<8x128xf32>
    %c13_31 = arith.constant 13 : index
    %c0_32 = arith.constant 0 : index
    %c0_33 = arith.constant 0 : index
    %61 = vector.load %arg2[%c13_31, %c0_32, %c0_33] : memref<30x8x128xf32, #tpu.memory_space<vmem>>, vector<1x8x128xf32>
    %62 = vector.shape_cast %61 : vector<1x8x128xf32> to vector<8x128xf32>
    %63 = arith.subf %60, %62 : vector<8x128xf32>
    %64 = arith.mulf %63, %63 : vector<8x128xf32>
    %65 = arith.select %15, %64, %10 : vector<8x128xi1>, vector<8x128xf32>
    %66 = arith.addf %58, %65 : vector<8x128xf32>
    %c14 = arith.constant 14 : index
    %c0_34 = arith.constant 0 : index
    %c0_35 = arith.constant 0 : index
    %67 = vector.load %arg1[%c14, %c0_34, %c0_35] : memref<30x8x128xf32, #tpu.memory_space<vmem>>, vector<1x8x128xf32>
    %68 = vector.shape_cast %67 : vector<1x8x128xf32> to vector<8x128xf32>
    %c14_36 = arith.constant 14 : index
    %c0_37 = arith.constant 0 : index
    %c0_38 = arith.constant 0 : index
    %69 = vector.load %arg2[%c14_36, %c0_37, %c0_38] : memref<30x8x128xf32, #tpu.memory_space<vmem>>, vector<1x8x128xf32>
    %70 = vector.shape_cast %69 : vector<1x8x128xf32> to vector<8x128xf32>
    %71 = arith.subf %68, %70 : vector<8x128xf32>
    %72 = arith.mulf %71, %71 : vector<8x128xf32>
    %73 = arith.select %15, %72, %10 : vector<8x128xi1>, vector<8x128xf32>
    %74 = arith.addf %66, %73 : vector<8x128xf32>
    %c15 = arith.constant 15 : index
    %c0_39 = arith.constant 0 : index
    %c0_40 = arith.constant 0 : index
    %75 = vector.load %arg1[%c15, %c0_39, %c0_40] : memref<30x8x128xf32, #tpu.memory_space<vmem>>, vector<1x8x128xf32>
    %76 = vector.shape_cast %75 : vector<1x8x128xf32> to vector<8x128xf32>
    %c15_41 = arith.constant 15 : index
    %c0_42 = arith.constant 0 : index
    %c0_43 = arith.constant 0 : index
    %77 = vector.load %arg2[%c15_41, %c0_42, %c0_43] : memref<30x8x128xf32, #tpu.memory_space<vmem>>, vector<1x8x128xf32>
    %78 = vector.shape_cast %77 : vector<1x8x128xf32> to vector<8x128xf32>
    %79 = arith.subf %76, %78 : vector<8x128xf32>
    %80 = arith.mulf %79, %79 : vector<8x128xf32>
    %81 = arith.select %15, %80, %10 : vector<8x128xi1>, vector<8x128xf32>
    %82 = arith.addf %74, %81 : vector<8x128xf32>
    %c16 = arith.constant 16 : index
    %c0_44 = arith.constant 0 : index
    %c0_45 = arith.constant 0 : index
    %83 = vector.load %arg1[%c16, %c0_44, %c0_45] : memref<30x8x128xf32, #tpu.memory_space<vmem>>, vector<1x8x128xf32>
    %84 = vector.shape_cast %83 : vector<1x8x128xf32> to vector<8x128xf32>
    %c16_46 = arith.constant 16 : index
    %c0_47 = arith.constant 0 : index
    %c0_48 = arith.constant 0 : index
    %85 = vector.load %arg2[%c16_46, %c0_47, %c0_48] : memref<30x8x128xf32, #tpu.memory_space<vmem>>, vector<1x8x128xf32>
    %86 = vector.shape_cast %85 : vector<1x8x128xf32> to vector<8x128xf32>
    %87 = arith.subf %84, %86 : vector<8x128xf32>
    %88 = arith.mulf %87, %87 : vector<8x128xf32>
    %89 = arith.select %15, %88, %10 : vector<8x128xi1>, vector<8x128xf32>
    %90 = arith.addf %82, %89 : vector<8x128xf32>
    %c17 = arith.constant 17 : index
    %c0_49 = arith.constant 0 : index
    %c0_50 = arith.constant 0 : index
    %91 = vector.load %arg1[%c17, %c0_49, %c0_50] : memref<30x8x128xf32, #tpu.memory_space<vmem>>, vector<1x8x128xf32>
    %92 = vector.shape_cast %91 : vector<1x8x128xf32> to vector<8x128xf32>
    %c17_51 = arith.constant 17 : index
    %c0_52 = arith.constant 0 : index
    %c0_53 = arith.constant 0 : index
    %93 = vector.load %arg2[%c17_51, %c0_52, %c0_53] : memref<30x8x128xf32, #tpu.memory_space<vmem>>, vector<1x8x128xf32>
    %94 = vector.shape_cast %93 : vector<1x8x128xf32> to vector<8x128xf32>
    %95 = arith.subf %92, %94 : vector<8x128xf32>
    %96 = arith.mulf %95, %95 : vector<8x128xf32>
    %97 = arith.select %15, %96, %10 : vector<8x128xi1>, vector<8x128xf32>
    %98 = arith.addf %90, %97 : vector<8x128xf32>
    %c18 = arith.constant 18 : index
    %c0_54 = arith.constant 0 : index
    %c0_55 = arith.constant 0 : index
    %99 = vector.load %arg1[%c18, %c0_54, %c0_55] : memref<30x8x128xf32, #tpu.memory_space<vmem>>, vector<1x8x128xf32>
    %100 = vector.shape_cast %99 : vector<1x8x128xf32> to vector<8x128xf32>
    %c18_56 = arith.constant 18 : index
    %c0_57 = arith.constant 0 : index
    %c0_58 = arith.constant 0 : index
    %101 = vector.load %arg2[%c18_56, %c0_57, %c0_58] : memref<30x8x128xf32, #tpu.memory_space<vmem>>, vector<1x8x128xf32>
    %102 = vector.shape_cast %101 : vector<1x8x128xf32> to vector<8x128xf32>
    %103 = arith.subf %100, %102 : vector<8x128xf32>
    %104 = arith.mulf %103, %103 : vector<8x128xf32>
    %105 = arith.select %15, %104, %10 : vector<8x128xi1>, vector<8x128xf32>
    %106 = arith.addf %98, %105 : vector<8x128xf32>
    %c19 = arith.constant 19 : index
    %c0_59 = arith.constant 0 : index
    %c0_60 = arith.constant 0 : index
    %107 = vector.load %arg1[%c19, %c0_59, %c0_60] : memref<30x8x128xf32, #tpu.memory_space<vmem>>, vector<1x8x128xf32>
    %108 = vector.shape_cast %107 : vector<1x8x128xf32> to vector<8x128xf32>
    %c19_61 = arith.constant 19 : index
    %c0_62 = arith.constant 0 : index
    %c0_63 = arith.constant 0 : index
    %109 = vector.load %arg2[%c19_61, %c0_62, %c0_63] : memref<30x8x128xf32, #tpu.memory_space<vmem>>, vector<1x8x128xf32>
    %110 = vector.shape_cast %109 : vector<1x8x128xf32> to vector<8x128xf32>
    %111 = arith.subf %108, %110 : vector<8x128xf32>
    %112 = arith.mulf %111, %111 : vector<8x128xf32>
    %113 = arith.select %15, %112, %10 : vector<8x128xi1>, vector<8x128xf32>
    %114 = arith.addf %106, %113 : vector<8x128xf32>
    %c20 = arith.constant 20 : index
    %c0_64 = arith.constant 0 : index
    %c0_65 = arith.constant 0 : index
    %115 = vector.load %arg1[%c20, %c0_64, %c0_65] : memref<30x8x128xf32, #tpu.memory_space<vmem>>, vector<1x8x128xf32>
    %116 = vector.shape_cast %115 : vector<1x8x128xf32> to vector<8x128xf32>
    %c20_66 = arith.constant 20 : index
    %c0_67 = arith.constant 0 : index
    %c0_68 = arith.constant 0 : index
    %117 = vector.load %arg2[%c20_66, %c0_67, %c0_68] : memref<30x8x128xf32, #tpu.memory_space<vmem>>, vector<1x8x128xf32>
    %118 = vector.shape_cast %117 : vector<1x8x128xf32> to vector<8x128xf32>
    %119 = arith.subf %116, %118 : vector<8x128xf32>
    %120 = arith.mulf %119, %119 : vector<8x128xf32>
    %121 = arith.select %15, %120, %10 : vector<8x128xi1>, vector<8x128xf32>
    %122 = arith.addf %114, %121 : vector<8x128xf32>
    %c21 = arith.constant 21 : index
    %c0_69 = arith.constant 0 : index
    %c0_70 = arith.constant 0 : index
    %123 = vector.load %arg1[%c21, %c0_69, %c0_70] : memref<30x8x128xf32, #tpu.memory_space<vmem>>, vector<1x8x128xf32>
    %124 = vector.shape_cast %123 : vector<1x8x128xf32> to vector<8x128xf32>
    %c21_71 = arith.constant 21 : index
    %c0_72 = arith.constant 0 : index
    %c0_73 = arith.constant 0 : index
    %125 = vector.load %arg2[%c21_71, %c0_72, %c0_73] : memref<30x8x128xf32, #tpu.memory_space<vmem>>, vector<1x8x128xf32>
    %126 = vector.shape_cast %125 : vector<1x8x128xf32> to vector<8x128xf32>
    %127 = arith.subf %124, %126 : vector<8x128xf32>
    %128 = arith.mulf %127, %127 : vector<8x128xf32>
    %129 = arith.select %15, %128, %10 : vector<8x128xi1>, vector<8x128xf32>
    %130 = arith.addf %122, %129 : vector<8x128xf32>
    %c22 = arith.constant 22 : index
    %c0_74 = arith.constant 0 : index
    %c0_75 = arith.constant 0 : index
    %131 = vector.load %arg1[%c22, %c0_74, %c0_75] : memref<30x8x128xf32, #tpu.memory_space<vmem>>, vector<1x8x128xf32>
    %132 = vector.shape_cast %131 : vector<1x8x128xf32> to vector<8x128xf32>
    %c22_76 = arith.constant 22 : index
    %c0_77 = arith.constant 0 : index
    %c0_78 = arith.constant 0 : index
    %133 = vector.load %arg2[%c22_76, %c0_77, %c0_78] : memref<30x8x128xf32, #tpu.memory_space<vmem>>, vector<1x8x128xf32>
    %134 = vector.shape_cast %133 : vector<1x8x128xf32> to vector<8x128xf32>
    %135 = arith.subf %132, %134 : vector<8x128xf32>
    %136 = arith.mulf %135, %135 : vector<8x128xf32>
    %137 = arith.select %15, %136, %10 : vector<8x128xi1>, vector<8x128xf32>
    %138 = arith.addf %130, %137 : vector<8x128xf32>
    %c23 = arith.constant 23 : index
    %c0_79 = arith.constant 0 : index
    %c0_80 = arith.constant 0 : index
    %139 = vector.load %arg1[%c23, %c0_79, %c0_80] : memref<30x8x128xf32, #tpu.memory_space<vmem>>, vector<1x8x128xf32>
    %140 = vector.shape_cast %139 : vector<1x8x128xf32> to vector<8x128xf32>
    %c23_81 = arith.constant 23 : index
    %c0_82 = arith.constant 0 : index
    %c0_83 = arith.constant 0 : index
    %141 = vector.load %arg2[%c23_81, %c0_82, %c0_83] : memref<30x8x128xf32, #tpu.memory_space<vmem>>, vector<1x8x128xf32>
    %142 = vector.shape_cast %141 : vector<1x8x128xf32> to vector<8x128xf32>
    %143 = arith.subf %140, %142 : vector<8x128xf32>
    %144 = arith.mulf %143, %143 : vector<8x128xf32>
    %145 = arith.select %15, %144, %10 : vector<8x128xi1>, vector<8x128xf32>
    %146 = arith.addf %138, %145 : vector<8x128xf32>
    %c24 = arith.constant 24 : index
    %c0_84 = arith.constant 0 : index
    %c0_85 = arith.constant 0 : index
    %147 = vector.load %arg1[%c24, %c0_84, %c0_85] : memref<30x8x128xf32, #tpu.memory_space<vmem>>, vector<1x8x128xf32>
    %148 = vector.shape_cast %147 : vector<1x8x128xf32> to vector<8x128xf32>
    %c24_86 = arith.constant 24 : index
    %c0_87 = arith.constant 0 : index
    %c0_88 = arith.constant 0 : index
    %149 = vector.load %arg2[%c24_86, %c0_87, %c0_88] : memref<30x8x128xf32, #tpu.memory_space<vmem>>, vector<1x8x128xf32>
    %150 = vector.shape_cast %149 : vector<1x8x128xf32> to vector<8x128xf32>
    %151 = arith.subf %148, %150 : vector<8x128xf32>
    %152 = arith.mulf %151, %151 : vector<8x128xf32>
    %153 = arith.select %15, %152, %10 : vector<8x128xi1>, vector<8x128xf32>
    %154 = arith.addf %146, %153 : vector<8x128xf32>
    %c25 = arith.constant 25 : index
    %c0_89 = arith.constant 0 : index
    %c0_90 = arith.constant 0 : index
    %155 = vector.load %arg1[%c25, %c0_89, %c0_90] : memref<30x8x128xf32, #tpu.memory_space<vmem>>, vector<1x8x128xf32>
    %156 = vector.shape_cast %155 : vector<1x8x128xf32> to vector<8x128xf32>
    %c25_91 = arith.constant 25 : index
    %c0_92 = arith.constant 0 : index
    %c0_93 = arith.constant 0 : index
    %157 = vector.load %arg2[%c25_91, %c0_92, %c0_93] : memref<30x8x128xf32, #tpu.memory_space<vmem>>, vector<1x8x128xf32>
    %158 = vector.shape_cast %157 : vector<1x8x128xf32> to vector<8x128xf32>
    %159 = arith.subf %156, %158 : vector<8x128xf32>
    %160 = arith.mulf %159, %159 : vector<8x128xf32>
    %161 = arith.select %15, %160, %10 : vector<8x128xi1>, vector<8x128xf32>
    %162 = arith.addf %154, %161 : vector<8x128xf32>
    %c26 = arith.constant 26 : index
    %c0_94 = arith.constant 0 : index
    %c0_95 = arith.constant 0 : index
    %163 = vector.load %arg1[%c26, %c0_94, %c0_95] : memref<30x8x128xf32, #tpu.memory_space<vmem>>, vector<1x8x128xf32>
    %164 = vector.shape_cast %163 : vector<1x8x128xf32> to vector<8x128xf32>
    %c26_96 = arith.constant 26 : index
    %c0_97 = arith.constant 0 : index
    %c0_98 = arith.constant 0 : index
    %165 = vector.load %arg2[%c26_96, %c0_97, %c0_98] : memref<30x8x128xf32, #tpu.memory_space<vmem>>, vector<1x8x128xf32>
    %166 = vector.shape_cast %165 : vector<1x8x128xf32> to vector<8x128xf32>
    %167 = arith.subf %164, %166 : vector<8x128xf32>
    %168 = arith.mulf %167, %167 : vector<8x128xf32>
    %169 = arith.select %15, %168, %10 : vector<8x128xi1>, vector<8x128xf32>
    %170 = arith.addf %162, %169 : vector<8x128xf32>
    %c27 = arith.constant 27 : index
    %c0_99 = arith.constant 0 : index
    %c0_100 = arith.constant 0 : index
    %171 = vector.load %arg1[%c27, %c0_99, %c0_100] : memref<30x8x128xf32, #tpu.memory_space<vmem>>, vector<1x8x128xf32>
    %172 = vector.shape_cast %171 : vector<1x8x128xf32> to vector<8x128xf32>
    %c27_101 = arith.constant 27 : index
    %c0_102 = arith.constant 0 : index
    %c0_103 = arith.constant 0 : index
    %173 = vector.load %arg2[%c27_101, %c0_102, %c0_103] : memref<30x8x128xf32, #tpu.memory_space<vmem>>, vector<1x8x128xf32>
    %174 = vector.shape_cast %173 : vector<1x8x128xf32> to vector<8x128xf32>
    %175 = arith.subf %172, %174 : vector<8x128xf32>
    %176 = arith.mulf %175, %175 : vector<8x128xf32>
    %177 = arith.select %15, %176, %10 : vector<8x128xi1>, vector<8x128xf32>
    %178 = arith.addf %170, %177 : vector<8x128xf32>
    %c28 = arith.constant 28 : index
    %c0_104 = arith.constant 0 : index
    %c0_105 = arith.constant 0 : index
    %179 = vector.load %arg1[%c28, %c0_104, %c0_105] : memref<30x8x128xf32, #tpu.memory_space<vmem>>, vector<1x8x128xf32>
    %180 = vector.shape_cast %179 : vector<1x8x128xf32> to vector<8x128xf32>
    %c28_106 = arith.constant 28 : index
    %c0_107 = arith.constant 0 : index
    %c0_108 = arith.constant 0 : index
    %181 = vector.load %arg2[%c28_106, %c0_107, %c0_108] : memref<30x8x128xf32, #tpu.memory_space<vmem>>, vector<1x8x128xf32>
    %182 = vector.shape_cast %181 : vector<1x8x128xf32> to vector<8x128xf32>
    %183 = arith.subf %180, %182 : vector<8x128xf32>
    %184 = arith.mulf %183, %183 : vector<8x128xf32>
    %185 = arith.select %15, %184, %10 : vector<8x128xi1>, vector<8x128xf32>
    %186 = arith.addf %178, %185 : vector<8x128xf32>
    %c29 = arith.constant 29 : index
    %c0_109 = arith.constant 0 : index
    %c0_110 = arith.constant 0 : index
    %187 = vector.load %arg1[%c29, %c0_109, %c0_110] : memref<30x8x128xf32, #tpu.memory_space<vmem>>, vector<1x8x128xf32>
    %188 = vector.shape_cast %187 : vector<1x8x128xf32> to vector<8x128xf32>
    %c29_111 = arith.constant 29 : index
    %c0_112 = arith.constant 0 : index
    %c0_113 = arith.constant 0 : index
    %189 = vector.load %arg2[%c29_111, %c0_112, %c0_113] : memref<30x8x128xf32, #tpu.memory_space<vmem>>, vector<1x8x128xf32>
    %190 = vector.shape_cast %189 : vector<1x8x128xf32> to vector<8x128xf32>
    %191 = arith.subf %188, %190 : vector<8x128xf32>
    %192 = arith.mulf %191, %191 : vector<8x128xf32>
    %193 = arith.select %15, %192, %10 : vector<8x128xi1>, vector<8x128xf32>
    %194 = arith.addf %186, %193 : vector<8x128xf32>
    %c0_114 = arith.constant 0 : index
    %c0_115 = arith.constant 0 : index
    %c0_116 = arith.constant 0 : index
    %195 = vector.load %arg2[%c0_114, %c0_115, %c0_116] : memref<30x8x128xf32, #tpu.memory_space<vmem>>, vector<1x8x128xf32>
    %196 = vector.shape_cast %195 : vector<1x8x128xf32> to vector<8x128xf32>
    %c1 = arith.constant 1 : index
    %c0_117 = arith.constant 0 : index
    %c0_118 = arith.constant 0 : index
    %197 = vector.load %arg2[%c1, %c0_117, %c0_118] : memref<30x8x128xf32, #tpu.memory_space<vmem>>, vector<1x8x128xf32>
    %198 = vector.shape_cast %197 : vector<1x8x128xf32> to vector<8x128xf32>
    %c2 = arith.constant 2 : index
    %c0_119 = arith.constant 0 : index
    %c0_120 = arith.constant 0 : index
    %199 = vector.load %arg2[%c2, %c0_119, %c0_120] : memref<30x8x128xf32, #tpu.memory_space<vmem>>, vector<1x8x128xf32>
    %200 = vector.shape_cast %199 : vector<1x8x128xf32> to vector<8x128xf32>
    %c3 = arith.constant 3 : index
    %c0_121 = arith.constant 0 : index
    %c0_122 = arith.constant 0 : index
    %201 = vector.load %arg2[%c3, %c0_121, %c0_122] : memref<30x8x128xf32, #tpu.memory_space<vmem>>, vector<1x8x128xf32>
    %202 = vector.shape_cast %201 : vector<1x8x128xf32> to vector<8x128xf32>
    %c5 = arith.constant 5 : index
    %c0_123 = arith.constant 0 : index
    %c0_124 = arith.constant 0 : index
    %203 = vector.load %arg2[%c5, %c0_123, %c0_124] : memref<30x8x128xf32, #tpu.memory_space<vmem>>, vector<1x8x128xf32>
    %204 = vector.shape_cast %203 : vector<1x8x128xf32> to vector<8x128xf32>
    %c6 = arith.constant 6 : index
    %c0_125 = arith.constant 0 : index
    %c0_126 = arith.constant 0 : index
    %205 = vector.load %arg2[%c6, %c0_125, %c0_126] : memref<30x8x128xf32, #tpu.memory_space<vmem>>, vector<1x8x128xf32>
    %206 = vector.shape_cast %205 : vector<1x8x128xf32> to vector<8x128xf32>
    %c7 = arith.constant 7 : index
    %c0_127 = arith.constant 0 : index
    %c0_128 = arith.constant 0 : index
    %207 = vector.load %arg2[%c7, %c0_127, %c0_128] : memref<30x8x128xf32, #tpu.memory_space<vmem>>, vector<1x8x128xf32>
    %208 = vector.shape_cast %207 : vector<1x8x128xf32> to vector<8x128xf32>
    %c8 = arith.constant 8 : index
    %c0_129 = arith.constant 0 : index
    %c0_130 = arith.constant 0 : index
    %209 = vector.load %arg2[%c8, %c0_129, %c0_130] : memref<30x8x128xf32, #tpu.memory_space<vmem>>, vector<1x8x128xf32>
    %210 = vector.shape_cast %209 : vector<1x8x128xf32> to vector<8x128xf32>
    %cst_131 = arith.constant 0.142857149 : f32
    %211 = vector.broadcast %cst_131 : f32 to vector<8x128xf32>
    %212 = arith.mulf %196, %211 : vector<8x128xf32>
    %cst_132 = arith.constant 5.000000e-01 : f32
    %213 = vector.broadcast %cst_132 : f32 to vector<8x128xf32>
    %214 = arith.mulf %213, %200 : vector<8x128xf32>
    %215 = arith.subf %212, %214 : vector<8x128xf32>
    %cst_133 = arith.constant 0.142857149 : f32
    %216 = vector.broadcast %cst_133 : f32 to vector<8x128xf32>
    %217 = arith.mulf %198, %216 : vector<8x128xf32>
    %cst_134 = arith.constant 5.000000e-01 : f32
    %218 = vector.broadcast %cst_134 : f32 to vector<8x128xf32>
    %219 = arith.mulf %218, %202 : vector<8x128xf32>
    %220 = arith.subf %217, %219 : vector<8x128xf32>
    %cst_135 = arith.constant 0.142857149 : f32
    %221 = vector.broadcast %cst_135 : f32 to vector<8x128xf32>
    %222 = arith.mulf %196, %221 : vector<8x128xf32>
    %cst_136 = arith.constant 5.000000e-01 : f32
    %223 = vector.broadcast %cst_136 : f32 to vector<8x128xf32>
    %224 = arith.mulf %223, %200 : vector<8x128xf32>
    %225 = arith.addf %222, %224 : vector<8x128xf32>
    %cst_137 = arith.constant 0.142857149 : f32
    %226 = vector.broadcast %cst_137 : f32 to vector<8x128xf32>
    %227 = arith.mulf %198, %226 : vector<8x128xf32>
    %cst_138 = arith.constant 5.000000e-01 : f32
    %228 = vector.broadcast %cst_138 : f32 to vector<8x128xf32>
    %229 = arith.mulf %228, %202 : vector<8x128xf32>
    %230 = arith.addf %227, %229 : vector<8x128xf32>
    %231 = arith.subf %225, %215 : vector<8x128xf32>
    %232 = arith.subf %230, %220 : vector<8x128xf32>
    %233 = arith.mulf %231, %232 : vector<8x128xf32>
    %c0_139 = arith.constant 0 : index
    %c0_140 = arith.constant 0 : index
    %c0_141 = arith.constant 0 : index
    %234 = vector.load %arg1[%c0_139, %c0_140, %c0_141] : memref<30x8x128xf32, #tpu.memory_space<vmem>>, vector<1x8x128xf32>
    %235 = vector.shape_cast %234 : vector<1x8x128xf32> to vector<8x128xf32>
    %c1_142 = arith.constant 1 : index
    %c0_143 = arith.constant 0 : index
    %c0_144 = arith.constant 0 : index
    %236 = vector.load %arg1[%c1_142, %c0_143, %c0_144] : memref<30x8x128xf32, #tpu.memory_space<vmem>>, vector<1x8x128xf32>
    %237 = vector.shape_cast %236 : vector<1x8x128xf32> to vector<8x128xf32>
    %c2_145 = arith.constant 2 : index
    %c0_146 = arith.constant 0 : index
    %c0_147 = arith.constant 0 : index
    %238 = vector.load %arg1[%c2_145, %c0_146, %c0_147] : memref<30x8x128xf32, #tpu.memory_space<vmem>>, vector<1x8x128xf32>
    %239 = vector.shape_cast %238 : vector<1x8x128xf32> to vector<8x128xf32>
    %c3_148 = arith.constant 3 : index
    %c0_149 = arith.constant 0 : index
    %c0_150 = arith.constant 0 : index
    %240 = vector.load %arg1[%c3_148, %c0_149, %c0_150] : memref<30x8x128xf32, #tpu.memory_space<vmem>>, vector<1x8x128xf32>
    %241 = vector.shape_cast %240 : vector<1x8x128xf32> to vector<8x128xf32>
    %c4_151 = arith.constant 4 : index
    %c0_152 = arith.constant 0 : index
    %c0_153 = arith.constant 0 : index
    %242 = vector.load %arg1[%c4_151, %c0_152, %c0_153] : memref<30x8x128xf32, #tpu.memory_space<vmem>>, vector<1x8x128xf32>
    %243 = vector.shape_cast %242 : vector<1x8x128xf32> to vector<8x128xf32>
    %cst_154 = arith.constant 0.142857149 : f32
    %244 = vector.broadcast %cst_154 : f32 to vector<8x128xf32>
    %245 = arith.mulf %235, %244 : vector<8x128xf32>
    %cst_155 = arith.constant 5.000000e-01 : f32
    %246 = vector.broadcast %cst_155 : f32 to vector<8x128xf32>
    %247 = arith.mulf %246, %239 : vector<8x128xf32>
    %248 = arith.subf %245, %247 : vector<8x128xf32>
    %cst_156 = arith.constant 0.142857149 : f32
    %249 = vector.broadcast %cst_156 : f32 to vector<8x128xf32>
    %250 = arith.mulf %237, %249 : vector<8x128xf32>
    %cst_157 = arith.constant 5.000000e-01 : f32
    %251 = vector.broadcast %cst_157 : f32 to vector<8x128xf32>
    %252 = arith.mulf %251, %241 : vector<8x128xf32>
    %253 = arith.subf %250, %252 : vector<8x128xf32>
    %cst_158 = arith.constant 0.142857149 : f32
    %254 = vector.broadcast %cst_158 : f32 to vector<8x128xf32>
    %255 = arith.mulf %235, %254 : vector<8x128xf32>
    %cst_159 = arith.constant 5.000000e-01 : f32
    %256 = vector.broadcast %cst_159 : f32 to vector<8x128xf32>
    %257 = arith.mulf %256, %239 : vector<8x128xf32>
    %258 = arith.addf %255, %257 : vector<8x128xf32>
    %cst_160 = arith.constant 0.142857149 : f32
    %259 = vector.broadcast %cst_160 : f32 to vector<8x128xf32>
    %260 = arith.mulf %237, %259 : vector<8x128xf32>
    %cst_161 = arith.constant 5.000000e-01 : f32
    %261 = vector.broadcast %cst_161 : f32 to vector<8x128xf32>
    %262 = arith.mulf %261, %241 : vector<8x128xf32>
    %263 = arith.addf %260, %262 : vector<8x128xf32>
    %264 = arith.minimumf %225, %258 : vector<8x128xf32>
    %265 = arith.maximumf %215, %248 : vector<8x128xf32>
    %266 = arith.subf %264, %265 : vector<8x128xf32>
    %cst_162 = arith.constant 0.000000e+00 : f32
    %267 = vector.broadcast %cst_162 : f32 to vector<8x128xf32>
    %268 = arith.maximumf %266, %267 : vector<8x128xf32>
    %269 = arith.minimumf %230, %263 : vector<8x128xf32>
    %270 = arith.maximumf %220, %253 : vector<8x128xf32>
    %271 = arith.subf %269, %270 : vector<8x128xf32>
    %cst_163 = arith.constant 0.000000e+00 : f32
    %272 = vector.broadcast %cst_163 : f32 to vector<8x128xf32>
    %273 = arith.maximumf %271, %272 : vector<8x128xf32>
    %274 = arith.mulf %268, %273 : vector<8x128xf32>
    %275 = arith.subf %258, %248 : vector<8x128xf32>
    %276 = arith.subf %263, %253 : vector<8x128xf32>
    %277 = arith.mulf %275, %276 : vector<8x128xf32>
    %278 = arith.addf %233, %277 : vector<8x128xf32>
    %279 = arith.subf %278, %274 : vector<8x128xf32>
    %cst_164 = arith.constant 9.99999996E-13 : f32
    %280 = vector.broadcast %cst_164 : f32 to vector<8x128xf32>
    %281 = arith.maximumf %279, %280 : vector<8x128xf32>
    %282 = arith.divf %274, %281 : vector<8x128xf32>
    %c5_165 = arith.constant 5 : index
    %c0_166 = arith.constant 0 : index
    %c0_167 = arith.constant 0 : index
    %283 = vector.load %arg1[%c5_165, %c0_166, %c0_167] : memref<30x8x128xf32, #tpu.memory_space<vmem>>, vector<1x8x128xf32>
    %284 = vector.shape_cast %283 : vector<1x8x128xf32> to vector<8x128xf32>
    %c6_168 = arith.constant 6 : index
    %c0_169 = arith.constant 0 : index
    %c0_170 = arith.constant 0 : index
    %285 = vector.load %arg1[%c6_168, %c0_169, %c0_170] : memref<30x8x128xf32, #tpu.memory_space<vmem>>, vector<1x8x128xf32>
    %286 = vector.shape_cast %285 : vector<1x8x128xf32> to vector<8x128xf32>
    %c7_171 = arith.constant 7 : index
    %c0_172 = arith.constant 0 : index
    %c0_173 = arith.constant 0 : index
    %287 = vector.load %arg1[%c7_171, %c0_172, %c0_173] : memref<30x8x128xf32, #tpu.memory_space<vmem>>, vector<1x8x128xf32>
    %288 = vector.shape_cast %287 : vector<1x8x128xf32> to vector<8x128xf32>
    %c8_174 = arith.constant 8 : index
    %c0_175 = arith.constant 0 : index
    %c0_176 = arith.constant 0 : index
    %289 = vector.load %arg1[%c8_174, %c0_175, %c0_176] : memref<30x8x128xf32, #tpu.memory_space<vmem>>, vector<1x8x128xf32>
    %290 = vector.shape_cast %289 : vector<1x8x128xf32> to vector<8x128xf32>
    %c9_177 = arith.constant 9 : index
    %c0_178 = arith.constant 0 : index
    %c0_179 = arith.constant 0 : index
    %291 = vector.load %arg1[%c9_177, %c0_178, %c0_179] : memref<30x8x128xf32, #tpu.memory_space<vmem>>, vector<1x8x128xf32>
    %292 = vector.shape_cast %291 : vector<1x8x128xf32> to vector<8x128xf32>
    %cst_180 = arith.constant 0.142857149 : f32
    %293 = vector.broadcast %cst_180 : f32 to vector<8x128xf32>
    %294 = arith.mulf %284, %293 : vector<8x128xf32>
    %cst_181 = arith.constant 5.000000e-01 : f32
    %295 = vector.broadcast %cst_181 : f32 to vector<8x128xf32>
    %296 = arith.mulf %295, %288 : vector<8x128xf32>
    %297 = arith.subf %294, %296 : vector<8x128xf32>
    %cst_182 = arith.constant 0.142857149 : f32
    %298 = vector.broadcast %cst_182 : f32 to vector<8x128xf32>
    %299 = arith.mulf %286, %298 : vector<8x128xf32>
    %cst_183 = arith.constant 5.000000e-01 : f32
    %300 = vector.broadcast %cst_183 : f32 to vector<8x128xf32>
    %301 = arith.mulf %300, %290 : vector<8x128xf32>
    %302 = arith.subf %299, %301 : vector<8x128xf32>
    %cst_184 = arith.constant 0.142857149 : f32
    %303 = vector.broadcast %cst_184 : f32 to vector<8x128xf32>
    %304 = arith.mulf %284, %303 : vector<8x128xf32>
    %cst_185 = arith.constant 5.000000e-01 : f32
    %305 = vector.broadcast %cst_185 : f32 to vector<8x128xf32>
    %306 = arith.mulf %305, %288 : vector<8x128xf32>
    %307 = arith.addf %304, %306 : vector<8x128xf32>
    %cst_186 = arith.constant 0.142857149 : f32
    %308 = vector.broadcast %cst_186 : f32 to vector<8x128xf32>
    %309 = arith.mulf %286, %308 : vector<8x128xf32>
    %cst_187 = arith.constant 5.000000e-01 : f32
    %310 = vector.broadcast %cst_187 : f32 to vector<8x128xf32>
    %311 = arith.mulf %310, %290 : vector<8x128xf32>
    %312 = arith.addf %309, %311 : vector<8x128xf32>
    %313 = arith.minimumf %225, %307 : vector<8x128xf32>
    %314 = arith.maximumf %215, %297 : vector<8x128xf32>
    %315 = arith.subf %313, %314 : vector<8x128xf32>
    %cst_188 = arith.constant 0.000000e+00 : f32
    %316 = vector.broadcast %cst_188 : f32 to vector<8x128xf32>
    %317 = arith.maximumf %315, %316 : vector<8x128xf32>
    %318 = arith.minimumf %230, %312 : vector<8x128xf32>
    %319 = arith.maximumf %220, %302 : vector<8x128xf32>
    %320 = arith.subf %318, %319 : vector<8x128xf32>
    %cst_189 = arith.constant 0.000000e+00 : f32
    %321 = vector.broadcast %cst_189 : f32 to vector<8x128xf32>
    %322 = arith.maximumf %320, %321 : vector<8x128xf32>
    %323 = arith.mulf %317, %322 : vector<8x128xf32>
    %324 = arith.subf %307, %297 : vector<8x128xf32>
    %325 = arith.subf %312, %302 : vector<8x128xf32>
    %326 = arith.mulf %324, %325 : vector<8x128xf32>
    %327 = arith.addf %233, %326 : vector<8x128xf32>
    %328 = arith.subf %327, %323 : vector<8x128xf32>
    %cst_190 = arith.constant 9.99999996E-13 : f32
    %329 = vector.broadcast %cst_190 : f32 to vector<8x128xf32>
    %330 = arith.maximumf %328, %329 : vector<8x128xf32>
    %331 = arith.divf %323, %330 : vector<8x128xf32>
    %c0_i32 = arith.constant 0 : i32
    %332 = vector.broadcast %c0_i32 : i32 to vector<8x128xi32>
    %333 = arith.cmpf ogt, %331, %282 : vector<8x128xf32>
    %334 = arith.select %333, %331, %282 : vector<8x128xi1>, vector<8x128xf32>
    %c1_i32 = arith.constant 1 : i32
    %335 = vector.broadcast %c1_i32 : i32 to vector<8x128xi32>
    %336 = arith.select %333, %335, %332 : vector<8x128xi1>, vector<8x128xi32>
    %c0_i32_191 = arith.constant 0 : i32
    %337 = vector.broadcast %c0_i32_191 : i32 to vector<8x128xi32>
    %338 = arith.cmpi eq, %336, %337 : vector<8x128xi32>
    %339 = arith.andi %15, %338 : vector<8x128xi1>
    %340 = arith.subf %235, %196 : vector<8x128xf32>
    %341 = arith.subf %237, %198 : vector<8x128xf32>
    %342 = arith.subf %239, %200 : vector<8x128xf32>
    %343 = arith.subf %241, %202 : vector<8x128xf32>
    %344 = arith.subf %243, %334 : vector<8x128xf32>
    %345 = arith.mulf %340, %340 : vector<8x128xf32>
    %346 = arith.mulf %341, %341 : vector<8x128xf32>
    %347 = arith.addf %345, %346 : vector<8x128xf32>
    %348 = arith.select %339, %347, %10 : vector<8x128xi1>, vector<8x128xf32>
    %349 = arith.addf %10, %348 : vector<8x128xf32>
    %350 = arith.mulf %342, %342 : vector<8x128xf32>
    %351 = arith.mulf %343, %343 : vector<8x128xf32>
    %352 = arith.addf %350, %351 : vector<8x128xf32>
    %353 = arith.select %339, %352, %10 : vector<8x128xi1>, vector<8x128xf32>
    %354 = arith.addf %10, %353 : vector<8x128xf32>
    %355 = arith.mulf %344, %344 : vector<8x128xf32>
    %356 = arith.select %339, %355, %10 : vector<8x128xi1>, vector<8x128xf32>
    %357 = arith.addf %10, %356 : vector<8x128xf32>
    %c1_i32_192 = arith.constant 1 : i32
    %358 = vector.broadcast %c1_i32_192 : i32 to vector<8x128xi32>
    %359 = arith.cmpi eq, %336, %358 : vector<8x128xi32>
    %360 = arith.andi %15, %359 : vector<8x128xi1>
    %361 = arith.subf %284, %204 : vector<8x128xf32>
    %362 = arith.subf %286, %206 : vector<8x128xf32>
    %363 = arith.subf %288, %208 : vector<8x128xf32>
    %364 = arith.subf %290, %210 : vector<8x128xf32>
    %365 = arith.subf %292, %334 : vector<8x128xf32>
    %366 = arith.mulf %361, %361 : vector<8x128xf32>
    %367 = arith.mulf %362, %362 : vector<8x128xf32>
    %368 = arith.addf %366, %367 : vector<8x128xf32>
    %369 = arith.select %360, %368, %10 : vector<8x128xi1>, vector<8x128xf32>
    %370 = arith.addf %349, %369 : vector<8x128xf32>
    %371 = arith.mulf %363, %363 : vector<8x128xf32>
    %372 = arith.mulf %364, %364 : vector<8x128xf32>
    %373 = arith.addf %371, %372 : vector<8x128xf32>
    %374 = arith.select %360, %373, %10 : vector<8x128xi1>, vector<8x128xf32>
    %375 = arith.addf %354, %374 : vector<8x128xf32>
    %376 = arith.mulf %365, %365 : vector<8x128xf32>
    %377 = arith.select %360, %376, %10 : vector<8x128xi1>, vector<8x128xf32>
    %378 = arith.addf %357, %377 : vector<8x128xf32>
    %379 = vector.shape_cast %370 : vector<8x128xf32> to vector<1x8x128xf32>
    %cst_193 = arith.constant dense<0.000000e+00> : vector<1xf32>
    %380 = vector.multi_reduction <add>, %379, %cst_193 [1, 2] : vector<1x8x128xf32> to vector<1xf32>
    %381 = vector.shape_cast %380 : vector<1xf32> to vector<1x1x1xf32>
    %382 = vector.extract %381[0, 0, 0] : f32 from vector<1x1x1xf32>
    %383 = vector.shape_cast %375 : vector<8x128xf32> to vector<1x8x128xf32>
    %cst_194 = arith.constant dense<0.000000e+00> : vector<1xf32>
    %384 = vector.multi_reduction <add>, %383, %cst_194 [1, 2] : vector<1x8x128xf32> to vector<1xf32>
    %385 = vector.shape_cast %384 : vector<1xf32> to vector<1x1x1xf32>
    %386 = vector.extract %385[0, 0, 0] : f32 from vector<1x1x1xf32>
    %387 = vector.shape_cast %378 : vector<8x128xf32> to vector<1x8x128xf32>
    %cst_195 = arith.constant dense<0.000000e+00> : vector<1xf32>
    %388 = vector.multi_reduction <add>, %387, %cst_195 [1, 2] : vector<1x8x128xf32> to vector<1xf32>
    %389 = vector.shape_cast %388 : vector<1xf32> to vector<1x1x1xf32>
    %390 = vector.extract %389[0, 0, 0] : f32 from vector<1x1x1xf32>
    %391 = vector.shape_cast %34 : vector<8x128xf32> to vector<1x8x128xf32>
    %cst_196 = arith.constant dense<0.000000e+00> : vector<1xf32>
    %392 = vector.multi_reduction <add>, %391, %cst_196 [1, 2] : vector<1x8x128xf32> to vector<1xf32>
    %393 = vector.shape_cast %392 : vector<1xf32> to vector<1x1x1xf32>
    %394 = vector.extract %393[0, 0, 0] : f32 from vector<1x1x1xf32>
    %395 = vector.shape_cast %194 : vector<8x128xf32> to vector<1x8x128xf32>
    %cst_197 = arith.constant dense<0.000000e+00> : vector<1xf32>
    %396 = vector.multi_reduction <add>, %395, %cst_197 [1, 2] : vector<1x8x128xf32> to vector<1xf32>
    %397 = vector.shape_cast %396 : vector<1xf32> to vector<1x1x1xf32>
    %398 = vector.extract %397[0, 0, 0] : f32 from vector<1x1x1xf32>
    %399 = tpu.iota {dimensions = array<i32: 1>} : vector<8x128xi32>
    %c0_i32_198 = arith.constant 0 : i32
    %400 = vector.broadcast %c0_i32_198 : i32 to vector<8x128xi32>
    %401 = arith.cmpi eq, %399, %400 : vector<8x128xi32>
    %c1_i32_199 = arith.constant 1 : i32
    %402 = vector.broadcast %c1_i32_199 : i32 to vector<8x128xi32>
    %403 = arith.cmpi eq, %399, %402 : vector<8x128xi32>
    %c2_i32 = arith.constant 2 : i32
    %404 = vector.broadcast %c2_i32 : i32 to vector<8x128xi32>
    %405 = arith.cmpi eq, %399, %404 : vector<8x128xi32>
    %c3_i32 = arith.constant 3 : i32
    %406 = vector.broadcast %c3_i32 : i32 to vector<8x128xi32>
    %407 = arith.cmpi eq, %399, %406 : vector<8x128xi32>
    %c4_i32 = arith.constant 4 : i32
    %408 = vector.broadcast %c4_i32 : i32 to vector<8x128xi32>
    %409 = arith.cmpi eq, %399, %408 : vector<8x128xi32>
    %cst_200 = arith.constant 0.000000e+00 : f32
    %410 = vector.broadcast %398 : f32 to vector<8x128xf32>
    %411 = vector.broadcast %cst_200 : f32 to vector<8x128xf32>
    %412 = arith.select %409, %410, %411 : vector<8x128xi1>, vector<8x128xf32>
    %413 = vector.broadcast %394 : f32 to vector<8x128xf32>
    %414 = arith.select %407, %413, %412 : vector<8x128xi1>, vector<8x128xf32>
    %415 = vector.broadcast %390 : f32 to vector<8x128xf32>
    %416 = arith.select %405, %415, %414 : vector<8x128xi1>, vector<8x128xf32>
    %417 = vector.broadcast %386 : f32 to vector<8x128xf32>
    %418 = arith.select %403, %417, %416 : vector<8x128xi1>, vector<8x128xf32>
    %419 = vector.broadcast %382 : f32 to vector<8x128xf32>
    %420 = arith.select %401, %419, %418 : vector<8x128xi1>, vector<8x128xf32>
    %c0_201 = arith.constant 0 : index
    %c0_202 = arith.constant 0 : index
    %c0_203 = arith.constant 0 : index
    %421 = vector.load %arg3[%c0_201, %c0_202, %c0_203] : memref<1x8x128xf32, #tpu.memory_space<vmem>>, vector<1x8x128xf32>
    %422 = vector.shape_cast %421 : vector<1x8x128xf32> to vector<8x128xf32>
    %423 = vector.shape_cast %420 : vector<8x128xf32> to vector<1x8x128xf32>
    tpu.vector_store %arg3[%c0_201, %c0_202, %c0_203], %423 {strides = array<i32>} : memref<1x8x128xf32, #tpu.memory_space<vmem>>, vector<1x8x128xf32>,
    return
  }
  func.func @transform_0(%arg0: i32) -> (i32, i32, i32) {
    %c0_i32 = arith.constant 0 : i32
    %c0_i32_0 = arith.constant 0 : i32
    %c0_i32_1 = arith.constant 0 : i32
    return %c0_i32, %arg0, %c0_i32_0 : i32, i32, i32
  }
  func.func @transform_1(%arg0: i32) -> (i32, i32, i32) {
    %c0_i32 = arith.constant 0 : i32
    %c0_i32_0 = arith.constant 0 : i32
    %c0_i32_1 = arith.constant 0 : i32
    return %c0_i32, %arg0, %c0_i32_0 : i32, i32, i32
  }
  func.func @transform_2(%arg0: i32) -> (i32, i32, i32) {
    %c0_i32 = arith.constant 0 : i32
    %c0_i32_0 = arith.constant 0 : i32
    %c0_i32_1 = arith.constant 0 : i32
    return %arg0, %c0_i32, %c0_i32_0 : i32, i32, i32
  }
}

</mosaic_0001>

<bundles_post_ra>
// kernel: tpu_custom_call.1
= control target key start
LH: loop header
LB: loop body
LE: loop exit
PB: predicated region body
PF: predicated region fallthrough
CT: control target
= control target key end

     0   :  { %7 = vsyncpa [#allocation3], 0  ;;  %s755_s0 = inlined_call_operand.hbm [shape: f32[30,8,128], index: 0, kind: input, shape index: {}]   ;;  %s756_s1 = inlined_call_operand.hbm [shape: f32[30,8,128], index: 1, kind: input, shape index: {}]   ;;  %s757_s2 = inlined_call_operand.hbm [shape: f32[1,8,128], index: 2, kind: output, shape index: {}]  }
   0x1   :  { %8 = vsyncpa [#allocation6], 0 }
   0x2   :  { %9 = vsyncpa [#allocation4], 0  ;;  %s533_s9 = smov [#allocation2]   ;;  %s461_s13 = scalar_lea.hbm %s755_s0, 3840 }
   0x3   :  { %s15_s10 = sshll.u32 %s533_s9, 4  ;;  %p462_p0 = scmp.ne.s32.totalorder %s755_s0, %s461_s13  ;;  %s16_s10 = int_to_ptr.vmem [resolvable:$true] %s15_s10 }
   0x4   :  { %p465_p1 = scmp.lt.u32.totalorder %s461_s13, %s755_s0 }
   0x6   :  { %p467_p2 = pnand %p465_p1, %p462_p0 }
   0x8   :  { %470 = shalt.err (!%p467_p2)
}
   0x9   :  { %s471_s18 = scalar_lea.vmem %s16_s10, 3840  ;;  %p476_p4 = scmp.lt.s32.totalorder %s16_s10, %s16_s10 }
   0xa   :  { %p472_p3 = scmp.ne.s32.totalorder %s16_s10, %s471_s18  ;;  %p477_p5 = scmp.lt.s32.totalorder %s471_s18, %s471_s18 }
   0xc   :  { %p478_p6 = por %p477_p5, %p476_p4 }
   0xe   :  { %p479_p7 = pnand %p478_p6, %p472_p3 }
  0x10   :  { %482 = shalt.err (!%p479_p7)
}
  0x11   :  { %s534_s19 = smov 128   ;;  %s535_s20 = smov 8  }
  0x12   :  { %21 = dma.hbm_to_vmem [thread:$0]  %s755_s0, 3840, %s16_s10, [#allocation3], %s534_s19, %s534_s19, %s535_s20  }
  0x13   :  { %s536_s23 = smov [#allocation5]   ;;  %s483_s27 = scalar_lea.hbm %s756_s1, 3840 }
  0x14   :  { %s27_s24 = sshll.u32 %s536_s23, 4  ;;  %p484_p8 = scmp.ne.s32.totalorder %s756_s1, %s483_s27  ;;  %s28_s24 = int_to_ptr.vmem [resolvable:$true] %s27_s24 }
  0x15   :  { %p487_p9 = scmp.lt.u32.totalorder %s483_s27, %s756_s1 }
  0x17   :  { %p489_p10 = pnand %p487_p9, %p484_p8 }
  0x19   :  { %492 = shalt.err (!%p489_p10)
}
  0x1a   :  { %s493_s4 = scalar_lea.vmem %s28_s24, 3840  ;;  %p498_p12 = scmp.lt.s32.totalorder %s28_s24, %s28_s24 }
  0x1b   :  { %p494_p11 = scmp.ne.s32.totalorder %s28_s24, %s493_s4  ;;  %p499_p13 = scmp.lt.s32.totalorder %s493_s4, %s493_s4 }
  0x1d   :  { %p500_p0 = por %p499_p13, %p498_p12 }
  0x1f   :  { %p501_p1 = pnand %p500_p0, %p494_p11 }
  0x21   :  { %504 = shalt.err (!%p501_p1)
}
  0x22   :  { %33 = dma.hbm_to_vmem [thread:$0]  %s756_s1, 3840, %s28_s24, [#allocation6], %s534_s19, %s534_s19, %s535_s20  }
  0x23   :  { %527 = dma.done.wait [#allocation3], 3840  }
  0x24   :  { %528 = vsyncadd [#allocation3], 4294963456 }
  0x25   :  { %529 = dma.done.wait [#allocation6], 3840  }
  0x26   :  { %530 = vsyncadd [#allocation6], 4294963456  ;;  %v41_v0 = vlaneseq  ;;  %v577_v1 = vld [vmem:[#allocation5] sm:$0xff]  ;;  %v579_v2 = vld [vmem:[#allocation5 + $0x8] sm:$0xff]  ;;  %s537_s10 = smov [#allocation7]  }
  0x27   :  { %v581_v3 = vld [vmem:[#allocation5 + $0x10] sm:$0xff]  ;;  %v583_v4 = vld [vmem:[#allocation5 + $0x18] sm:$0xff]  ;;  %v245_v5 = vmul.f32 0.14285715, %v577_v1  ;;  %v248_v7 = vmul.f32 0.14285715, %v579_v2 }
  0x28   :  { %v246_v6 = vmul.f32 0.5, %v581_v3  ;;  %v42_v8 = vshrl.u32 %v41_v0, 7  ;;  %v249_v9 = vmul.f32 0.5, %v583_v4  ;;  %v256_v10 = vld [vmem:[#allocation2] sm:$0xff]  ;;  %v589_v11 = vld [vmem:[#allocation2 + $0x8] sm:$0xff]  ;;  %v591_v12 = vld [vmem:[#allocation2 + $0x10] sm:$0xff] }
  0x29   :  { %v593_v15 = vld [vmem:[#allocation2 + $0x18] sm:$0xff]  ;;  %v263_v16 = vmul.f32 0.14285715, %v256_v10  ;;  %v264_v17 = vmul.f32 0.5, %v591_v12  ;;  %v596_v18 = vld [vmem:[#allocation2 + $0x28] sm:$0xff]  ;;  %v600_v23 = vld [vmem:[#allocation2 + $0x30] sm:$0xff] }
  0x2a   :  { %v247_v13 = vsub.f32 %v245_v5, %v246_v6  ;;  %v251_v14 = vadd.f32 %v246_v6, %v245_v5  ;;  %v250_v19 = vsub.f32 %v248_v7, %v249_v9  ;;  %v252_v20 = vadd.f32 %v249_v9, %v248_v7  ;;  %v602_v24 = vld [vmem:[#allocation2 + $0x38] sm:$0xff]  ;;  %v605_v32 = vld [vmem:[#allocation2 + $0x40] sm:$0xff]  ;;  %v617_v6 = vld [vmem:[#allocation5 + $0x20] sm:$0xff]  ;;  %s431_s11 = sshll.u32 %s537_s10, 4  ;;  %s432_s11 = int_to_ptr.vmem [resolvable:$true] %s431_s11 }
  0x2b   :  { %v266_v21 = vmul.f32 0.14285715, %v589_v11  ;;  %v267_v22 = vmul.f32 0.5, %v593_v15  ;;  %v265_v26 = vsub.f32 %v263_v16, %v264_v17  ;;  %v269_v27 = vadd.f32 %v264_v17, %v263_v16  ;;  %v71_v17 = vld [vmem:[#allocation2 + $0x50] sm:$0xff]  ;;  %s505_s12 = scalar_lea.vmem %s432_s11, 128  ;;  %p510_p3 = scmp.lt.s32.totalorder %s432_s11, %s432_s11 }
  0x2c   :  { %v253_v25 = vsub.f32 %v251_v14, %v247_v13  ;;  %v296_v28 = vmul.f32 0.14285715, %v596_v18  ;;  %v254_v29 = vsub.f32 %v252_v20, %v250_v19  ;;  %v297_v33 = vmul.f32 0.5, %v602_v24  ;;  %p506_p2 = scmp.ne.s32.totalorder %s432_s11, %s505_s12  ;;  %p511_p4 = scmp.lt.s32.totalorder %s505_s12, %s505_s12 }
  0x2d   :  { %v268_v30 = vsub.f32 %v266_v21, %v267_v22  ;;  %v270_v31 = vadd.f32 %v267_v22, %v266_v21  ;;  %v271_v34 = vmin.f32 %v251_v14, %v269_v27  ;;  %v272_v35 = vmax.f32 %v247_v13, %v265_v26 }
  0x2e   :  { %v280_v36 = vsub.f32 %v269_v27, %v265_v26  ;;  %v299_v37 = vmul.f32 0.14285715, %v600_v23  ;;  %v255_v38 = vmul.f32 %v254_v29, %v253_v25  ;;  %v298_v43 = vsub.f32 %v296_v28, %v297_v33  ;;  %v81_v25 = vld [vmem:[#allocation5 + $0x58] sm:$0xff]  ;;  %v87_v26 = vld [vmem:[#allocation2 + $0x60] sm:$0xff]  ;;  %v89_v27 = vld [vmem:[#allocation5 + $0x60] sm:$0xff]  ;;  %p512_p5 = por %p511_p4, %p510_p3 }
  0x2f   :  { %v275_v39 = vmin.f32 %v252_v20, %v270_v31  ;;  %v276_v40 = vmax.f32 %v250_v19, %v268_v30  ;;  %v281_v41 = vsub.f32 %v270_v31, %v268_v30  ;;  %v273_v42 = vsub.f32 %v271_v34, %v272_v35  ;;  %v97_v29 = vld [vmem:[#allocation5 + $0x68] sm:$0xff]  ;;  %v103_v31 = vld [vmem:[#allocation2 + $0x70] sm:$0xff]  ;;  %v240_v35 = vld [vmem:[#allocation5 + $0x30] sm:$0xff] }
  0x30   :  { %v300_v44 = vmul.f32 0.5, %v605_v32  ;;  %v302_v45 = vadd.f32 %v297_v33, %v296_v28  ;;  %v610_v46 = vand.u32 127, %v41_v0  ;;  %v45_v47 = vmul.u32 128, %v42_v8  ;;  %v95_v28 = vld [vmem:[#allocation2 + $0x68] sm:$0xff]  ;;  %v238_v30 = vld [vmem:[#allocation5 + $0x28] sm:$0xff]  ;;  %v105_v33 = vld [vmem:[#allocation5 + $0x70] sm:$0xff]  ;;  %p513_p6 = pnand %p512_p5, %p506_p2 }
  0x31   :  { %v277_v48 = vsub.f32 %v275_v39, %v276_v40  ;;  %v282_v49 = vmul.f32 %v281_v41, %v280_v36  ;;  %v274_v50 = vmax.f32 %v273_v42, 0.0  ;;  %v305_v56 = vmax.f32 %v247_v13, %v298_v43  ;;  %v111_v41 = vld [vmem:[#allocation2 + $0x78] sm:$0xff]  ;;  %v113_v42 = vld [vmem:[#allocation5 + $0x78] sm:$0xff] }
  0x32   :  { %v301_v51 = vsub.f32 %v299_v37, %v300_v44  ;;  %v303_v52 = vadd.f32 %v300_v44, %v299_v37  ;;  %v304_v53 = vmin.f32 %v251_v14, %v302_v45  ;;  %v313_v57 = vsub.f32 %v302_v45, %v298_v43 }
  0x33   :  { %v278_v54 = vmax.f32 %v277_v48, 0.0  ;;  %v283_v55 = vadd.f32 %v282_v49, %v255_v38  ;;  %v615_v63 = vadd.s32 %v45_v47, %v610_v46  ;;  %v326_v16 = vsub.f32 %v256_v10, %v577_v1  ;;  %v119_v48 = vld [vmem:[#allocation2 + $0x80] sm:$0xff]  ;;  %v121_v49 = vld [vmem:[#allocation5 + $0x80] sm:$0xff] }
  0x34   :  { %v308_v58 = vmin.f32 %v252_v20, %v303_v52  ;;  %v309_v59 = vmax.f32 %v250_v19, %v301_v51  ;;  %v314_v60 = vsub.f32 %v303_v52, %v301_v51  ;;  %v306_v62 = vsub.f32 %v304_v53, %v305_v56  ;;  %v73_v19 = vld [vmem:[#allocation5 + $0x50] sm:$0xff]  ;;  %v79_v20 = vld [vmem:[#allocation2 + $0x58] sm:$0xff]  ;;  %v242_v51 = vld [vmem:[#allocation5 + $0x38] sm:$0xff] }
  0x35   :  { %v612_v61 = vmul.f32 %v278_v54, %v274_v50  ;;  %vm49_vm0 = vcmp.lt.s32.totalorder %v615_v63, 784  ;;  %vm52_vm1 = vcmp.gt.f32.partialorder %v617_v6, 0.0  ;;  %v327_v22 = vsub.f32 %v589_v11, %v579_v2  ;;  %v127_v54 = vld [vmem:[#allocation2 + $0x88] sm:$0xff]  ;;  %v244_v56 = vld [vmem:[#allocation5 + $0x40] sm:$0xff] }
  0x36   :  { %v310_v0 = vsub.f32 %v308_v58, %v309_v59  ;;  %v315_v5 = vmul.f32 %v314_v60, %v313_v57  ;;  %v307_v8 = vmax.f32 %v306_v62, 0.0  ;;  %v74_v10 = vsub.f32 %v71_v17, %v73_v19  ;;  %vm630_vm2 = vmand %vm52_vm1, %vm49_vm0  ;;  %v135_v60 = vld [vmem:[#allocation2 + $0x90] sm:$0xff] }
  0x37   :  { %v284_v7 = vsub.f32 %v283_v55, %v612_v61  ;;  %v634_v2 = vmul.f32 %v326_v16, %v326_v16  ;;  %v82_v11 = vsub.f32 %v79_v20, %v81_v25  ;;  %v90_v36 = vsub.f32 %v87_v26, %v89_v27  ;;  %v129_v55 = vld [vmem:[#allocation5 + $0x88] sm:$0xff] }
  0x38   :  { %v311_v9 = vmax.f32 %v310_v0, 0.0  ;;  %v316_v14 = vadd.f32 %v315_v5, %v255_v38  ;;  %v636_v38 = vmul.f32 %v327_v22, %v327_v22  ;;  %v75_v39 = vmul.f32 %v74_v10, %v74_v10  ;;  %v153_v22 = vld [vmem:[#allocation5 + $0xa0] sm:$0xff]  ;;  %v65_v25 = vld [vmem:[#allocation5 + $0x48] sm:$0xff] }
  0x39   :  { %v285_v13 = vmax.f32 %v284_v7, 1e-12  ;;  %v98_v40 = vsub.f32 %v95_v28, %v97_v29  ;;  %v346_v43 = vsub.f32 %v596_v18, %v238_v30  ;;  %vm54_vm3 = vcmp.eq.f32.partialorder %v617_v6, 0.0  ;;  %v137_v7 = vld [vmem:[#allocation5 + $0x90] sm:$0xff] }
  0x3a   :  { %v623_v21 = vmul.f32 %v311_v9, %v307_v8  ;;  %v83_v44 = vmul.f32 %v82_v11, %v82_v11  ;;  %v91_v45 = vmul.f32 %v90_v36, %v90_v36  ;;  %v106_v47 = vsub.f32 %v103_v31, %v105_v33  ;;  %v143_v8 = vld [vmem:[#allocation2 + $0x98] sm:$0xff]  ;;  %v145_v9 = vld [vmem:[#allocation5 + $0x98] sm:$0xff]  ;;  %vm674_vm4 = vmand %vm54_vm3, %vm49_vm0 }
  0x3b   :  { %457 = vrcp.f32 %v285_v13  ;;  %v347_v50 = vsub.f32 %v600_v23, %v240_v35  ;;  %v76_v52 = vsel %vm630_vm2, %v75_v39, 0.0  ;;  %v99_v53 = vmul.f32 %v98_v40, %v98_v40  ;;  %v63_v33 = vld [vmem:[#allocation2 + $0x48] sm:$0xff]  ;;  %v161_v39 = vld [vmem:[#allocation5 + $0xa8] sm:$0xff] }
  0x3c   :  { %v317_v1 = vsub.f32 %v316_v14, %v623_v21  ;;  %v84_v18 = vsel %vm630_vm2, %v83_v44, 0.0  ;;  %v92_v57 = vsel %vm630_vm2, %v91_v45, 0.0  ;;  %v107_v58 = vmul.f32 %v106_v47, %v106_v47  ;;  %v651_v14 = vld [vmem:[#allocation2 + $0x20] sm:$0xff] }
  0x3d   :  { %v114_v59 = vsub.f32 %v111_v41, %v113_v42  ;;  %v328_v23 = vsub.f32 %v591_v12, %v581_v3  ;;  %v329_v62 = vsub.f32 %v593_v15, %v583_v4  ;;  %v85_v0 = vadd.f32 %v84_v18, %v76_v52  ;;  %v151_v15 = vld [vmem:[#allocation2 + $0xa0] sm:$0xff] }
  0x3e   :  { %v318_v37 = vmax.f32 %v317_v1, 1e-12  ;;  %v122_v5 = vsub.f32 %v119_v48, %v121_v49  ;;  %v348_v13 = vsub.f32 %v602_v24, %v242_v51  ;;  %v100_v16 = vsel %vm630_vm2, %v99_v53, 0.0  ;;  %v167_v49 = vld [vmem:[#allocation2 + $0xb0] sm:$0xff] }
  0x3f   :  { %v115_v17 = vmul.f32 %v114_v59, %v114_v59  ;;  %v130_v19 = vsub.f32 %v127_v54, %v129_v55  ;;  %v351_v20 = vmul.f32 %v346_v43, %v346_v43  ;;  %v349_v3 = vsub.f32 %v605_v32, %v244_v56  ;;  %v175_v59 = vld [vmem:[#allocation2 + $0xb8] sm:$0xff] }
  0x40   :  { %459 = vrcp.f32 %v318_v37  ;;  %v58_v4 = vsub.f32 %v651_v14, %v617_v6  ;;  %v93_v12 = vadd.f32 %v92_v57, %v85_v0  ;;  %v108_v26 = vsel %vm630_vm2, %v107_v58, 0.0  ;;  %v159_v37 = vld [vmem:[#allocation2 + $0xa8] sm:$0xff]  ;;  %v183_v6 = vld [vmem:[#allocation2 + $0xc0] sm:$0xff] }
  0x41   :  { %v123_v27 = vmul.f32 %v122_v5, %v122_v5  ;;  %v138_v24 = vsub.f32 %v135_v60, %v137_v7  ;;  %v146_v28 = vsub.f32 %v143_v8, %v145_v9  ;;  %v352_v30 = vmul.f32 %v347_v50, %v347_v50  ;;  %v169_v50 = vld [vmem:[#allocation5 + $0xb0] sm:$0xff] }
  0x42   :  { %v336_v1 = vmul.f32 %v328_v23, %v328_v23  ;;  %v337_v10 = vmul.f32 %v329_v62, %v329_v62  ;;  %v101_v31 = vadd.f32 %v100_v16, %v93_v12  ;;  %v356_v32 = vmul.f32 %v348_v13, %v348_v13  ;;  %v185_v62 = vld [vmem:[#allocation5 + $0xc0] sm:$0xff] }
  0x43   :  { %v116_v35 = vsel %vm630_vm2, %v115_v17, 0.0  ;;  %v131_v11 = vmul.f32 %v130_v19, %v130_v19  ;;  %v154_v36 = vsub.f32 %v151_v15, %v153_v22  ;;  %v357_v40 = vmul.f32 %v349_v3, %v349_v3 }
  0x44   :  { %v663_v41 = vmul.f32 %v58_v4, %v58_v4  ;;  %v66_v42 = vsub.f32 %v63_v33, %v65_v25  ;;  %v109_v43 = vadd.f32 %v108_v26, %v101_v31  ;;  %v124_v45 = vsel %vm630_vm2, %v123_v27, 0.0  ;;  %v191_v25 = vld [vmem:[#allocation2 + $0xc8] sm:$0xff]  ;;  %v193_v26 = vld [vmem:[#allocation5 + $0xc8] sm:$0xff] }
  0x45   :  { %v458_v29 = vpop.eup %457  ;;  %v139_v47 = vmul.f32 %v138_v24, %v138_v24  ;;  %v147_v48 = vmul.f32 %v146_v28, %v146_v28  ;;  %v333_v52 = vadd.f32 %v636_v38, %v634_v2  ;;  %v353_v53 = vadd.f32 %v352_v30, %v351_v20  ;;  %v177_v2 = vld [vmem:[#allocation5 + $0xb8] sm:$0xff] }
  0x46   :  { %v287_v44 = vmul.f32 %v458_v29, %v612_v61  ;;  %v117_v61 = vadd.f32 %v116_v35, %v109_v43  ;;  %v162_v55 = vsub.f32 %v159_v37, %v161_v39  ;;  %v338_v18 = vadd.f32 %v337_v10, %v336_v1  ;;  %v209_v43 = vld [vmem:[#allocation5 + $0xd8] sm:$0xff] }
  0x47   :  { %v132_v57 = vsel %vm630_vm2, %v131_v11, 0.0  ;;  %v155_v58 = vmul.f32 %v154_v36, %v154_v36  ;;  %v358_v38 = vadd.f32 %v357_v40, %v356_v32  ;;  %v67_v60 = vmul.f32 %v66_v42, %v66_v42  ;;  %v201_v32 = vld [vmem:[#allocation5 + $0xd0] sm:$0xff]  ;;  %v207_v42 = vld [vmem:[#allocation2 + $0xd8] sm:$0xff] }
  0x48   :  { %v125_v63 = vadd.f32 %v124_v45, %v117_v61  ;;  %v170_v23 = vsub.f32 %v167_v49, %v169_v50  ;;  %v60_v0 = vsel %vm674_vm4, %v663_v41, 0.0  ;;  %v148_v5 = vsel %vm630_vm2, %v147_v48, 0.0  ;;  %v215_v50 = vld [vmem:[#allocation2 + $0xe0] sm:$0xff] }
  0x49   :  { %v163_v9 = vmul.f32 %v162_v55, %v162_v55  ;;  %v178_v13 = vsub.f32 %v175_v59, %v177_v2  ;;  %v156_v20 = vsel %vm630_vm2, %v155_v58, 0.0  ;;  %v186_v3 = vsub.f32 %v183_v6, %v185_v62  ;;  %v223_v55 = vld [vmem:[#allocation2 + $0xe8] sm:$0xff] }
  0x4a   :  { %v460_v51 = vpop.eup %459  ;;  %v133_v8 = vadd.f32 %v132_v57, %v125_v63  ;;  %v68_v1 = vsel %vm674_vm4, %v67_v60, 0.0  ;;  %v194_v37 = vsub.f32 %v191_v25, %v193_v26  ;;  %v210_v54 = vsub.f32 %v207_v42, %v209_v43 }
  0x4b   :  { %v320_v56 = vmul.f32 %v460_v51, %v623_v21  ;;  %v140_v21 = vsel %vm630_vm2, %v139_v47, 0.0  ;;  %v164_v31 = vsel %vm630_vm2, %v163_v9, 0.0  ;;  %v179_v36 = vmul.f32 %v178_v13, %v178_v13  ;;  %v217_v51 = vld [vmem:[#allocation5 + $0xe0] sm:$0xff] }
  0x4c   :  { %v141_v22 = vadd.f32 %v140_v21, %v133_v8  ;;  %v187_v45 = vmul.f32 %v186_v3, %v186_v3  ;;  %v69_v48 = vadd.f32 %v68_v1, %v60_v0  ;;  %v218_v58 = vsub.f32 %v215_v50, %v217_v51 }
  0x4d   :  { %vm321_vm5 = vcmp.gt.f32.partialorder %v320_v56, %v287_v44  ;;  %vm413_vm9 = vcmp.eq.s32.totalorder %v610_v46, 4  ;;  %vm412_vm10 = vcmp.eq.s32.totalorder %v610_v46, 3  ;;  %vm411_vm11 = vcmp.eq.s32.totalorder %v610_v46, 2 }
  0x4e   :  { %vm441_vm6 = vmneg %vm321_vm5  ;;  %v322_v7 = vsel %vm321_vm5, %v320_v56, %v287_v44  ;;  %v149_v10 = vadd.f32 %v148_v5, %v141_v22  ;;  %v225_v56 = vld [vmem:[#allocation5 + $0xe8] sm:$0xff]  ;;  %v219_v6 = vmul.f32 %v218_v58, %v218_v58  ;;  %vm410_vm12 = vcmp.eq.s32.totalorder %v610_v46, 1 }
  0x4f   :  { %vm692_vm7 = vmand %vm630_vm2, %vm441_vm6  ;;  %v330_v17 = vsub.f32 %v651_v14, %v322_v7  ;;  %v350_v19 = vsub.f32 %v63_v33, %v322_v7  ;;  %v171_v14 = vmul.f32 %v170_v23, %v170_v23  ;;  %v199_v33 = vld [vmem:[#allocation2 + $0xd0] sm:$0xff]  ;;  %v226_v60 = vsub.f32 %v223_v55, %v225_v56 }
  0x50   :  { %v334_v4 = vsel %vm692_vm7, %v333_v52, 0.0  ;;  %vm704_vm8 = vmand %vm630_vm2, %vm321_vm5  ;;  %v339_v15 = vsel %vm692_vm7, %v338_v18, 0.0  ;;  %v157_v41 = vadd.f32 %v156_v20, %v149_v10  ;;  %v202_v47 = vsub.f32 %v199_v33, %v201_v32 }
  0x51   :  { %v354_v27 = vsel %vm704_vm8, %v353_v53, 0.0  ;;  %v341_v24 = vmul.f32 %v330_v17, %v330_v17  ;;  %v361_v28 = vmul.f32 %v350_v19, %v350_v19  ;;  %v359_v29 = vsel %vm704_vm8, %v358_v38, 0.0 }
  0x52   :  { %v355_v30 = vadd.f32 %v354_v27, %v334_v4  ;;  %v360_v40 = vadd.f32 %v359_v29, %v339_v15  ;;  %v172_v44 = vsel %vm630_vm2, %v171_v14, 0.0  ;;  %v165_v49 = vadd.f32 %v164_v31, %v157_v41 }
  0x53   :  { %v342_v35 = vsel %vm692_vm7, %v341_v24, 0.0  ;;  %v362_v11 = vsel %vm704_vm8, %v361_v28, 0.0  ;;  %v180_v52 = vsel %vm630_vm2, %v179_v36, 0.0  ;;  %v195_v53 = vmul.f32 %v194_v37, %v194_v37 }
  0x54   :  { %364 = vadd.xlane.f32.xlu0 %v355_v30  ;;  %v363_v39 = vadd.f32 %v362_v11, %v342_v35  ;;  %v173_v61 = vadd.f32 %v172_v44, %v165_v49  ;;  %v188_v18 = vsel %vm630_vm2, %v187_v45, 0.0  ;;  %v203_v57 = vmul.f32 %v202_v47, %v202_v47 }
  0x55   :  { %v196_v2 = vsel %vm630_vm2, %v195_v53, 0.0  ;;  %v211_v38 = vmul.f32 %v210_v54, %v210_v54  ;;  %v227_v21 = vmul.f32 %v226_v60, %v226_v60  ;;  %v220_v7 = vsel %vm630_vm2, %v219_v6, 0.0 }
  0x56   :  { %382 = vadd.xlane.f32.xlu1 %v363_v39  ;;  %v181_v59 = vadd.f32 %v180_v52, %v173_v61  ;;  %v204_v23 = vsel %vm630_vm2, %v203_v57, 0.0  ;;  %vm409_vm13 = vcmp.eq.s32.totalorder %v610_v46, 0 }
  0x57   :  { %v212_v0 = vsel %vm630_vm2, %v211_v38, 0.0  ;;  %v228_v9 = vsel %vm630_vm2, %v227_v21, 0.0 }
  0x58   :  { %373 = vadd.xlane.f32.xlu0 %v360_v40  ;;  %v189_v63 = vadd.f32 %v188_v18, %v181_v59 }
  0x5a   :  { %391 = vadd.xlane.f32.xlu1 %v69_v48  ;;  %v197_v62 = vadd.f32 %v196_v2, %v189_v63 }
  0x5c   :  { %v205_v5 = vadd.f32 %v204_v23, %v197_v62 }
  0x5e   :  { %v213_v8 = vadd.f32 %v212_v0, %v205_v5 }
  0x60   :  { %v221_v13 = vadd.f32 %v220_v7, %v213_v8 }
  0x62   :  { %v229_v16 = vadd.f32 %v228_v9, %v221_v13 }
  0x64   :  { %400 = vadd.xlane.f32.xlu0 %v229_v16 }
  0xe1   :  { %v365_v17 = vpop.xlane.xlu0 %364 }
  0xe2   :  { %v366_v19 = vrot.slane %v365_v17, 4 }
  0xe3   :  { %v383_v20 = vpop.xlane.xlu1 %382 }
  0xe4   :  { %v367_v3 = vadd.f32 %v366_v19, %v365_v17  ;;  %v384_v4 = vrot.slane %v383_v20, 4 }
  0xe5   :  { %v374_v12 = vpop.xlane.xlu0 %373 }
  0xe6   :  { %v368_v15 = vrot.slane %v367_v3, 2  ;;  %v385_v22 = vadd.f32 %v384_v4, %v383_v20  ;;  %v375_v14 = vrot.slane %v374_v12, 4 }
  0xe7   :  { %v392_v25 = vpop.xlane.xlu1 %391 }
  0xe8   :  { %v386_v26 = vrot.slane %v385_v22, 2  ;;  %v376_v27 = vadd.f32 %v375_v14, %v374_v12  ;;  %v393_v24 = vrot.slane %v392_v25, 4  ;;  %v369_v28 = vadd.f32 %v368_v15, %v367_v3 }
  0xea   :  { %v377_v29 = vrot.slane %v376_v27, 2  ;;  %v394_v34 = vadd.f32 %v393_v24, %v392_v25  ;;  %v370_v30 = vrot.slane %v369_v28, 1  ;;  %v387_v1 = vadd.f32 %v386_v26, %v385_v22 }
  0xec   :  { %v395_v10 = vrot.slane %v394_v34, 2  ;;  %v371_v31 = vadd.f32 %v370_v30, %v369_v28  ;;  %v378_v33 = vadd.f32 %v377_v29, %v376_v27  ;;  %v388_v32 = vrot.slane %v387_v1, 1 }
  0xee   :  { %v396_v35 = vadd.f32 %v395_v10, %v394_v34  ;;  %442 = vpush %v371_v31  ;;  %v379_v11 = vrot.slane %v378_v33, 1  ;;  %v389_v36 = vadd.f32 %v388_v32, %v387_v1 }
  0xf0   :  { %v380_v37 = vadd.f32 %v379_v11, %v378_v33  ;;  %v397_v39 = vrot.slane %v396_v35, 1 }
  0xf1   :  { %v401_v41 = vpop.xlane.xlu0 %400 }
  0xf2   :  { %444 = vpush %v380_v37  ;;  %v398_v40 = vadd.f32 %v397_v39, %v396_v35  ;;  %v402_v42 = vrot.slane %v401_v41, 4 }
  0xf3   :  { %446 = vpush %v389_v36 }
  0xf4   :  { %448 = vpush %v398_v40  ;;  %v403_v43 = vadd.f32 %v402_v42, %v401_v41 }
  0xf6   :  { %v404_v44 = vrot.slane %v403_v43, 2 }
  0xf8   :  { %v405_v45 = vadd.f32 %v404_v44, %v403_v43 }
  0xfa   :  { %v406_v47 = vrot.slane %v405_v45, 1 }
  0xfc   :  { %v407_v48 = vadd.f32 %v406_v47, %v405_v45 }
  0xfe   :  { %450 = vpush %v407_v48 }
 0x11f   :  { %s443_s1 = spop %442 }
 0x120   :  { %v422_v55 = vstv %s443_s1 }
 0x123   :  { %s445_s6 = spop %444 }
 0x124   :  { %s447_s7 = spop %446  ;;  %v420_v54 = vstv %s445_s6 }
 0x125   :  { %s449_s8 = spop %448  ;;  %v418_v52 = vstv %s447_s7 }
 0x126   :  { %v416_v50 = vstv %s449_s8 }
 0x12f   :  { %s451_s9 = spop %450 }
 0x130   :  { %v414_v49 = vstv %s451_s9 }
 0x131   :  { %v415_v51 = vsel %vm413_vm9, %v414_v49, 0.0 }
 0x132   :  { %v417_v53 = vsel %vm412_vm10, %v416_v50, %v415_v51 }
 0x133   :  { %v419_v61 = vsel %vm411_vm11, %v418_v52, %v417_v53 }
 0x134   :  { %v421_v56 = vsel %vm410_vm12, %v420_v54, %v419_v61 }
 0x135   :  { %v423_v18 = vsel %vm409_vm13, %v422_v55, %v421_v56 }
 0x136   :  { %424 = vst [vmem:[#allocation7] sm:$0xff] %v423_v18 }
 0x137   :  { %516 = shalt.err (!%p513_p6)
}
 0x138   :  { %s517_s15 = scalar_lea.hbm %s757_s2, 128 }
 0x139   :  { %p518_p7 = scmp.ne.s32.totalorder %s757_s2, %s517_s15  ;;  %p521_p8 = scmp.lt.u32.totalorder %s517_s15, %s757_s2 }
 0x13b   :  { %p523_p9 = pnand %p521_p8, %p518_p7 }
 0x13d   :  { %526 = shalt.err (!%p523_p9)
}
 0x13e   :  { %434 = dma.vmem_to_hbm [thread:$0]  %s432_s11, 128, %s757_s2, [#allocation4]  }
 0x13f   :  { %531 = dma.done.wait [#allocation4], 128  }
 0x140   :  { %532 = vsyncadd [#allocation4], 4294967168 }
 0x141   :  { %438 = vsyncpa [#allocation3], 1 }
 0x142   :  { %439 = vsyncpa [#allocation6], 1 }
 0x143   :  { %440 = vsyncpa [#allocation4], 1 }

</bundles_post_ra>
